<compile_context>
chip_gen: v6e
topology: v6e:2x2x1
jax: 0.10.0
libtpu: 0.0.40
codegen_flags: <defaults>
</compile_context>

<pallas_src>
import jax
import jax.numpy as jnp
from jax.experimental import pallas as pl
from jax.experimental.pallas import tpu as pltpu


def _round_up(x, m):
    return (x + m - 1) // m * m


# --------------------------------------------------------------------------
# Fused kernel: per-tile projections (MXU) + pairwise relu/l2/sigmoid (VPU)
# --------------------------------------------------------------------------
def _fused_kernel(post_ref, et_ref, wa_ref, ba_ref, wbt_ref, bb_ref, w_ref,
                  out_ref, a_sc, bt_sc):
    # post_ref : [tp, F]   VMEM  — post rows for this P tile
    # et_ref   : [F, te]   VMEM  — emoji rows (transposed) for this E tile
    # wa_ref   : [F, F]    VMEM  — folded post-side weight  (k1 -> l1 first half)
    # ba_ref   : [1, F]    VMEM  — folded post-side bias
    # wbt_ref  : [F, F]    VMEM  — folded emoji-side weight, transposed
    # bb_ref   : [F, 1]    VMEM  — folded emoji-side bias (+ l1 bias)
    # w_ref    : [F + 1]   SMEM  — w_ref[:F] = l2 weight, w_ref[F] = l2 bias
    # out_ref  : [tp, te]        — lane-dense output tile
    # a_sc     : [tp, F]   VMEM scratch, bt_sc : [F, te] VMEM scratch
    feat = post_ref.shape[1]

    # Stage 1 (MXU): tile-local projections into the folded l1 space.
    a_sc[...] = (
        jnp.dot(post_ref[...], wa_ref[...], preferred_element_type=jnp.float32)
        + ba_ref[...]
    )
    bt_sc[...] = (
        jnp.dot(wbt_ref[...], et_ref[...], preferred_element_type=jnp.float32)
        + bb_ref[...]
    )

    # Stage 2 (VPU): outer-product FMA accumulation over features on a
    # lane-dense [tp, te] accumulator; no [tp, te, F] hidden, no lane reduce.
    acc = jnp.zeros(out_ref.shape, jnp.float32) + w_ref[feat]  # init with l2 bias
    # Static unroll: F is small; full LLO scheduler visibility.
    # TODO(synk): chunk this loop (lax.fori_loop) if F ever gets very large.
    for f in range(feat):
        af = a_sc[:, f : f + 1]      # [tp, 1] — broadcast across lanes
        bf = bt_sc[f : f + 1, :]     # [1, te] — broadcast across sublanes
        acc = acc + jnp.maximum(af + bf, 0.0) * w_ref[f]

    out_ref[...] = jax.nn.sigmoid(acc).astype(out_ref.dtype)


# --------------------------------------------------------------------------
# Wrapper
# --------------------------------------------------------------------------
def score_lp_predicter2(post, emoji, params, *, tp_max=128, te_max=256):
    P, F = post.shape
    E, _ = emoji.shape

    # ---- constant folding of k1/k2 into the split l1 weight (wrapper side;
    #      const-folded under jit, exact same math as the torch module) ----
    l1w_t = params["l1_w"].T                              # [2F, F]
    l1wp, l1we = l1w_t[:F, :], l1w_t[F:, :]               # [F, F] each
    wa = params["k1_w"].T @ l1wp                          # [F, F]
    ba = (params["k1_b"] @ l1wp).reshape(1, F)            # [1, F]
    wbt = (params["k2_w"].T @ l1we).T                     # [F, F]  (= Wb^T)
    bb = (params["k2_b"] @ l1we + params["l1_b"]).reshape(F, 1)  # [F, 1]

    # l2 weight (out_feat = 1) + bias, packed for SMEM.
    w_smem = jnp.concatenate(
        [params["l2_w"].reshape(F), params["l2_b"].reshape(1)]
    ).astype(jnp.float32)

    # ---- tiling: sublane-aligned P tile, lane-dense (multiple-of-128) E tile;
    #      tp*te*4B accumulator stays within the vreg budget and the per-step
    #      VMEM footprint is far below every chip's VMEM limit. ----
    tp = min(_round_up(P, 8), tp_max)
    te = min(_round_up(E, 128), te_max)
    ppad = _round_up(P, tp)
    epad = _round_up(E, te)
    post_p = jnp.pad(post, ((0, ppad - P), (0, 0))) if ppad != P else post
    emoji_p = jnp.pad(emoji, ((0, epad - E), (0, 0))) if epad != E else emoji
    emoji_t = emoji_p.T                                   # [F, Epad], lane = emoji idx

    grid = (ppad // tp, epad // te)
    cost = pl.CostEstimate(
        flops=grid[0] * grid[1] * (2 * tp * F * F + 2 * F * F * te)  # per-tile matmuls
        + 4 * ppad * epad * F,                                       # add+relu+mul+acc
        transcendentals=ppad * epad,                                 # sigmoid
        bytes_accessed=4 * (grid[1] * ppad * F + grid[0] * epad * F
                            + 2 * F * F + 2 * F + ppad * epad),
    )

    out = pl.pallas_call(
        _fused_kernel,
        out_shape=jax.ShapeDtypeStruct((ppad, epad), jnp.float32),
        grid=grid,
        in_specs=[
            pl.BlockSpec((tp, F), lambda i, j: (i, 0)),       # post tile
            pl.BlockSpec((F, te), lambda i, j: (0, j)),       # emoji^T tile
            pl.BlockSpec((F, F), lambda i, j: (0, 0)),        # Wa
            pl.BlockSpec((1, F), lambda i, j: (0, 0)),        # ba
            pl.BlockSpec((F, F), lambda i, j: (0, 0)),        # Wb^T
            pl.BlockSpec((F, 1), lambda i, j: (0, 0)),        # bb
            pl.BlockSpec(memory_space=pltpu.MemorySpace.SMEM),  # l2 weight + bias
        ],
        out_specs=pl.BlockSpec((tp, te), lambda i, j: (i, j)),
        scratch_shapes=[
            pltpu.VMEM((tp, F), jnp.float32),                 # a  (post-side proj)
            pltpu.VMEM((F, te), jnp.float32),                 # bt (emoji-side proj)
        ],
        compiler_params=pltpu.CompilerParams(
            dimension_semantics=("parallel", "parallel"),
            vmem_limit_bytes=32 * 1024 * 1024,
        ),
        cost_estimate=cost,
    )(post_p, emoji_t, wa, ba, wbt, bb, w_smem)
    return out[:P, :E]


# --------------------------------------------------------------------------
# Pure-JAX reference (mirrors the torch forward exactly)
# --------------------------------------------------------------------------
def reference(post, emoji, params):
    kp = post @ params["k1_w"].T + params["k1_b"]
    ke = emoji @ params["k2_w"].T + params["k2_b"]
    P, E = post.shape[0], emoji.shape[0]
    x = jnp.concatenate(
        [jnp.tile(kp[:, None, :], (1, E, 1)), jnp.tile(ke[None, :, :], (P, 1, 1))],
        axis=-1,
    )
    h = jax.nn.relu(x @ params["l1_w"].T + params["l1_b"])
    return jax.nn.sigmoid(h @ params["l2_w"].T + params["l2_b"]).squeeze(-1)


def init_params(key, in_feat, out_feat=1):
    # Deterministic torch.nn.Linear-style init: U(-1/sqrt(fan_in), 1/sqrt(fan_in)).
    ks = jax.random.split(key, 8)

    def lin(kw, kb, fan_in, fan_out):
        bound = 1.0 / jnp.sqrt(jnp.float32(fan_in))
        w = jax.random.uniform(kw, (fan_out, fan_in), jnp.float32, -bound, bound)
        b = jax.random.uniform(kb, (fan_out,), jnp.float32, -bound, bound)
        return w, b

    k1_w, k1_b = lin(ks[0], ks[1], in_feat, in_feat)
    k2_w, k2_b = lin(ks[2], ks[3], in_feat, in_feat)
    l1_w, l1_b = lin(ks[4], ks[5], 2 * in_feat, in_feat)
    l2_w, l2_b = lin(ks[6], ks[7], in_feat, out_feat)
    return dict(k1_w=k1_w, k1_b=k1_b, k2_w=k2_w, k2_b=k2_b,
                l1_w=l1_w, l1_b=l1_b, l2_w=l2_w, l2_b=l2_b)


if __name__ == "__main__":
    in_feat = 32

    key = jax.random.PRNGKey(0)
    kpost, kemoji, kparams = jax.random.split(key, 3)
    params = init_params(kparams, in_feat, out_feat=1)

    # Small case (single grid step, no padding on P).
    P, E = 8, 8
    post = jax.random.normal(kpost, (P, in_feat), jnp.float32)
    emoji = jax.random.normal(kemoji, (E, in_feat), jnp.float32)
    out = jax.block_until_ready(score_lp_predicter2(post, emoji, params))
    ref = reference(post, emoji, params)
    assert out.shape == (P, E)
    # atol slightly loosened vs 1e-5: k1/k2 are algebraically folded into l1,
    # which reorders f32 accumulation (same math, different rounding).
    assert jnp.allclose(out, ref, atol=1e-4, rtol=1e-4), "mismatch vs reference (8x8)"

    # Padded case (exercises P/E padding and slicing).
    P2, E2 = 20, 200
    post2 = jax.random.normal(jax.random.fold_in(kpost, 1), (P2, in_feat), jnp.float32)
    emoji2 = jax.random.normal(jax.random.fold_in(kemoji, 1), (E2, in_feat), jnp.float32)
    out2 = jax.block_until_ready(score_lp_predicter2(post2, emoji2, params))
    ref2 = reference(post2, emoji2, params)
    assert out2.shape == (P2, E2)
    assert jnp.allclose(out2, ref2, atol=1e-4, rtol=1e-4), "mismatch vs reference (20x200)"

    print("KERNEL_OK")
</pallas_src>

<mosaic_0001>
module attributes {stable_mosaic.version = 11 : i64} {
  func.func @_fused_kernel(%arg0: i32, %arg1: i32, %arg2: memref<8x32xf32, #tpu.memory_space<vmem>>, %arg3: memref<32x128xf32, #tpu.memory_space<vmem>>, %arg4: memref<32x32xf32, #tpu.memory_space<vmem>>, %arg5: memref<1x32xf32, #tpu.memory_space<vmem>>, %arg6: memref<32x32xf32, #tpu.memory_space<vmem>>, %arg7: memref<32x1xf32, #tpu.memory_space<vmem>>, %arg8: memref<33xf32, #tpu.memory_space<smem>>, %arg9: memref<8x128xf32, #tpu.memory_space<vmem>>, %arg10: memref<8x32xf32, #tpu.memory_space<vmem>>, %arg11: memref<32x128xf32, #tpu.memory_space<vmem>>) attributes {dimension_semantics = [#tpu.dimension_semantics<parallel>, #tpu.dimension_semantics<parallel>], iteration_bounds = array<i64: 1, 1>, scalar_prefetch = 0 : i64, scratch_operands = 2 : i64, tpu.core_type = #tpu.core_type<tc>, window_params = [{transform_indices = @transform_0, window_bounds = array<i64: 8, 32>}, {transform_indices = @transform_1, window_bounds = array<i64: 32, 128>}, {pipeline_mode = #tpu.pipeline_mode<synchronous>, transform_indices = @transform_2, window_bounds = array<i64: 32, 32>}, {pipeline_mode = #tpu.pipeline_mode<synchronous>, transform_indices = @transform_3, window_bounds = array<i64: 1, 32>}, {pipeline_mode = #tpu.pipeline_mode<synchronous>, transform_indices = @transform_4, window_bounds = array<i64: 32, 32>}, {pipeline_mode = #tpu.pipeline_mode<synchronous>, transform_indices = @transform_5, window_bounds = array<i64: 32, 1>}, {transform_indices = @transform_6, window_bounds = array<i64: 33>}, {transform_indices = @transform_7, window_bounds = array<i64: 8, 128>}]} {
    %c0 = arith.constant 0 : index
    %c0_0 = arith.constant 0 : index
    %0 = vector.load %arg2[%c0, %c0_0] : memref<8x32xf32, #tpu.memory_space<vmem>>, vector<8x32xf32>
    %c0_1 = arith.constant 0 : index
    %c0_2 = arith.constant 0 : index
    %1 = vector.load %arg4[%c0_1, %c0_2] : memref<32x32xf32, #tpu.memory_space<vmem>>, vector<32x32xf32>
    %cst = arith.constant dense<0.000000e+00> : vector<8x32xf32>
    %2 = tpu.matmul %0, %1, %cst {dimension_numbers = #tpu.dot_dimension_numbers<[1], [0], [0], [1], [0, 0, 1, 1], [], []>} : vector<8x32xf32>, vector<32x32xf32>, vector<8x32xf32> -> vector<8x32xf32>
    %c0_3 = arith.constant 0 : index
    %c0_4 = arith.constant 0 : index
    %3 = vector.load %arg5[%c0_3, %c0_4] : memref<1x32xf32, #tpu.memory_space<vmem>>, vector<1x32xf32>
    %4 = vector.broadcast %3 : vector<1x32xf32> to vector<8x32xf32>
    %5 = arith.addf %2, %4 : vector<8x32xf32>
    %c0_5 = arith.constant 0 : index
    %c0_6 = arith.constant 0 : index
    %6 = vector.load %arg10[%c0_5, %c0_6] : memref<8x32xf32, #tpu.memory_space<vmem>>, vector<8x32xf32>
    tpu.vector_store %arg10[%c0_5, %c0_6], %5 {strides = array<i32>} : memref<8x32xf32, #tpu.memory_space<vmem>>, vector<8x32xf32>,
    %c0_7 = arith.constant 0 : index
    %c0_8 = arith.constant 0 : index
    %7 = vector.load %arg6[%c0_7, %c0_8] : memref<32x32xf32, #tpu.memory_space<vmem>>, vector<32x32xf32>
    %c0_9 = arith.constant 0 : index
    %c0_10 = arith.constant 0 : index
    %8 = vector.load %arg3[%c0_9, %c0_10] : memref<32x128xf32, #tpu.memory_space<vmem>>, vector<32x128xf32>
    %cst_11 = arith.constant dense<0.000000e+00> : vector<32x128xf32>
    %9 = tpu.matmul %7, %8, %cst_11 {dimension_numbers = #tpu.dot_dimension_numbers<[1], [0], [0], [1], [0, 0, 1, 1], [], []>} : vector<32x32xf32>, vector<32x128xf32>, vector<32x128xf32> -> vector<32x128xf32>
    %c0_12 = arith.constant 0 : index
    %c0_13 = arith.constant 0 : index
    %10 = vector.load %arg7[%c0_12, %c0_13] : memref<32x1xf32, #tpu.memory_space<vmem>>, vector<32x1xf32>
    %11 = vector.broadcast %10 : vector<32x1xf32> to vector<32x128xf32>
    %12 = arith.addf %9, %11 : vector<32x128xf32>
    %c0_14 = arith.constant 0 : index
    %c0_15 = arith.constant 0 : index
    %13 = vector.load %arg11[%c0_14, %c0_15] : memref<32x128xf32, #tpu.memory_space<vmem>>, vector<32x128xf32>
    tpu.vector_store %arg11[%c0_14, %c0_15], %12 {strides = array<i32>} : memref<32x128xf32, #tpu.memory_space<vmem>>, vector<32x128xf32>,
    %cst_16 = arith.constant 0.000000e+00 : f32
    %14 = vector.broadcast %cst_16 : f32 to vector<8x128xf32>
    %c32 = arith.constant 32 : index
    %15 = memref.load %arg8[%c32] : memref<33xf32, #tpu.memory_space<smem>>
    %16 = vector.broadcast %15 : f32 to vector<8x128xf32>
    %17 = arith.addf %14, %16 : vector<8x128xf32>
    %c0_17 = arith.constant 0 : index
    %c0_18 = arith.constant 0 : index
    %18 = vector.load %arg10[%c0_17, %c0_18] : memref<8x32xf32, #tpu.memory_space<vmem>>, vector<8x1xf32>
    %c0_19 = arith.constant 0 : index
    %c0_20 = arith.constant 0 : index
    %19 = vector.load %arg11[%c0_19, %c0_20] : memref<32x128xf32, #tpu.memory_space<vmem>>, vector<1x128xf32>
    %20 = vector.broadcast %18 : vector<8x1xf32> to vector<8x128xf32>
    %21 = vector.broadcast %19 : vector<1x128xf32> to vector<8x128xf32>
    %22 = arith.addf %20, %21 : vector<8x128xf32>
    %cst_21 = arith.constant 0.000000e+00 : f32
    %23 = vector.broadcast %cst_21 : f32 to vector<8x128xf32>
    %24 = arith.maximumf %22, %23 : vector<8x128xf32>
    %c0_22 = arith.constant 0 : index
    %25 = memref.load %arg8[%c0_22] : memref<33xf32, #tpu.memory_space<smem>>
    %26 = vector.broadcast %25 : f32 to vector<8x128xf32>
    %27 = arith.mulf %24, %26 : vector<8x128xf32>
    %28 = arith.addf %17, %27 : vector<8x128xf32>
    %c0_23 = arith.constant 0 : index
    %c1 = arith.constant 1 : index
    %29 = vector.load %arg10[%c0_23, %c1] : memref<8x32xf32, #tpu.memory_space<vmem>>, vector<8x1xf32>
    %c1_24 = arith.constant 1 : index
    %c0_25 = arith.constant 0 : index
    %30 = vector.load %arg11[%c1_24, %c0_25] : memref<32x128xf32, #tpu.memory_space<vmem>>, vector<1x128xf32>
    %31 = vector.broadcast %29 : vector<8x1xf32> to vector<8x128xf32>
    %32 = vector.broadcast %30 : vector<1x128xf32> to vector<8x128xf32>
    %33 = arith.addf %31, %32 : vector<8x128xf32>
    %cst_26 = arith.constant 0.000000e+00 : f32
    %34 = vector.broadcast %cst_26 : f32 to vector<8x128xf32>
    %35 = arith.maximumf %33, %34 : vector<8x128xf32>
    %c1_27 = arith.constant 1 : index
    %36 = memref.load %arg8[%c1_27] : memref<33xf32, #tpu.memory_space<smem>>
    %37 = vector.broadcast %36 : f32 to vector<8x128xf32>
    %38 = arith.mulf %35, %37 : vector<8x128xf32>
    %39 = arith.addf %28, %38 : vector<8x128xf32>
    %c0_28 = arith.constant 0 : index
    %c2 = arith.constant 2 : index
    %40 = vector.load %arg10[%c0_28, %c2] : memref<8x32xf32, #tpu.memory_space<vmem>>, vector<8x1xf32>
    %c2_29 = arith.constant 2 : index
    %c0_30 = arith.constant 0 : index
    %41 = vector.load %arg11[%c2_29, %c0_30] : memref<32x128xf32, #tpu.memory_space<vmem>>, vector<1x128xf32>
    %42 = vector.broadcast %40 : vector<8x1xf32> to vector<8x128xf32>
    %43 = vector.broadcast %41 : vector<1x128xf32> to vector<8x128xf32>
    %44 = arith.addf %42, %43 : vector<8x128xf32>
    %cst_31 = arith.constant 0.000000e+00 : f32
    %45 = vector.broadcast %cst_31 : f32 to vector<8x128xf32>
    %46 = arith.maximumf %44, %45 : vector<8x128xf32>
    %c2_32 = arith.constant 2 : index
    %47 = memref.load %arg8[%c2_32] : memref<33xf32, #tpu.memory_space<smem>>
    %48 = vector.broadcast %47 : f32 to vector<8x128xf32>
    %49 = arith.mulf %46, %48 : vector<8x128xf32>
    %50 = arith.addf %39, %49 : vector<8x128xf32>
    %c0_33 = arith.constant 0 : index
    %c3 = arith.constant 3 : index
    %51 = vector.load %arg10[%c0_33, %c3] : memref<8x32xf32, #tpu.memory_space<vmem>>, vector<8x1xf32>
    %c3_34 = arith.constant 3 : index
    %c0_35 = arith.constant 0 : index
    %52 = vector.load %arg11[%c3_34, %c0_35] : memref<32x128xf32, #tpu.memory_space<vmem>>, vector<1x128xf32>
    %53 = vector.broadcast %51 : vector<8x1xf32> to vector<8x128xf32>
    %54 = vector.broadcast %52 : vector<1x128xf32> to vector<8x128xf32>
    %55 = arith.addf %53, %54 : vector<8x128xf32>
    %cst_36 = arith.constant 0.000000e+00 : f32
    %56 = vector.broadcast %cst_36 : f32 to vector<8x128xf32>
    %57 = arith.maximumf %55, %56 : vector<8x128xf32>
    %c3_37 = arith.constant 3 : index
    %58 = memref.load %arg8[%c3_37] : memref<33xf32, #tpu.memory_space<smem>>
    %59 = vector.broadcast %58 : f32 to vector<8x128xf32>
    %60 = arith.mulf %57, %59 : vector<8x128xf32>
    %61 = arith.addf %50, %60 : vector<8x128xf32>
    %c0_38 = arith.constant 0 : index
    %c4 = arith.constant 4 : index
    %62 = vector.load %arg10[%c0_38, %c4] : memref<8x32xf32, #tpu.memory_space<vmem>>, vector<8x1xf32>
    %c4_39 = arith.constant 4 : index
    %c0_40 = arith.constant 0 : index
    %63 = vector.load %arg11[%c4_39, %c0_40] : memref<32x128xf32, #tpu.memory_space<vmem>>, vector<1x128xf32>
    %64 = vector.broadcast %62 : vector<8x1xf32> to vector<8x128xf32>
    %65 = vector.broadcast %63 : vector<1x128xf32> to vector<8x128xf32>
    %66 = arith.addf %64, %65 : vector<8x128xf32>
    %cst_41 = arith.constant 0.000000e+00 : f32
    %67 = vector.broadcast %cst_41 : f32 to vector<8x128xf32>
    %68 = arith.maximumf %66, %67 : vector<8x128xf32>
    %c4_42 = arith.constant 4 : index
    %69 = memref.load %arg8[%c4_42] : memref<33xf32, #tpu.memory_space<smem>>
    %70 = vector.broadcast %69 : f32 to vector<8x128xf32>
    %71 = arith.mulf %68, %70 : vector<8x128xf32>
    %72 = arith.addf %61, %71 : vector<8x128xf32>
    %c0_43 = arith.constant 0 : index
    %c5 = arith.constant 5 : index
    %73 = vector.load %arg10[%c0_43, %c5] : memref<8x32xf32, #tpu.memory_space<vmem>>, vector<8x1xf32>
    %c5_44 = arith.constant 5 : index
    %c0_45 = arith.constant 0 : index
    %74 = vector.load %arg11[%c5_44, %c0_45] : memref<32x128xf32, #tpu.memory_space<vmem>>, vector<1x128xf32>
    %75 = vector.broadcast %73 : vector<8x1xf32> to vector<8x128xf32>
    %76 = vector.broadcast %74 : vector<1x128xf32> to vector<8x128xf32>
    %77 = arith.addf %75, %76 : vector<8x128xf32>
    %cst_46 = arith.constant 0.000000e+00 : f32
    %78 = vector.broadcast %cst_46 : f32 to vector<8x128xf32>
    %79 = arith.maximumf %77, %78 : vector<8x128xf32>
    %c5_47 = arith.constant 5 : index
    %80 = memref.load %arg8[%c5_47] : memref<33xf32, #tpu.memory_space<smem>>
    %81 = vector.broadcast %80 : f32 to vector<8x128xf32>
    %82 = arith.mulf %79, %81 : vector<8x128xf32>
    %83 = arith.addf %72, %82 : vector<8x128xf32>
    %c0_48 = arith.constant 0 : index
    %c6 = arith.constant 6 : index
    %84 = vector.load %arg10[%c0_48, %c6] : memref<8x32xf32, #tpu.memory_space<vmem>>, vector<8x1xf32>
    %c6_49 = arith.constant 6 : index
    %c0_50 = arith.constant 0 : index
    %85 = vector.load %arg11[%c6_49, %c0_50] : memref<32x128xf32, #tpu.memory_space<vmem>>, vector<1x128xf32>
    %86 = vector.broadcast %84 : vector<8x1xf32> to vector<8x128xf32>
    %87 = vector.broadcast %85 : vector<1x128xf32> to vector<8x128xf32>
    %88 = arith.addf %86, %87 : vector<8x128xf32>
    %cst_51 = arith.constant 0.000000e+00 : f32
    %89 = vector.broadcast %cst_51 : f32 to vector<8x128xf32>
    %90 = arith.maximumf %88, %89 : vector<8x128xf32>
    %c6_52 = arith.constant 6 : index
    %91 = memref.load %arg8[%c6_52] : memref<33xf32, #tpu.memory_space<smem>>
    %92 = vector.broadcast %91 : f32 to vector<8x128xf32>
    %93 = arith.mulf %90, %92 : vector<8x128xf32>
    %94 = arith.addf %83, %93 : vector<8x128xf32>
    %c0_53 = arith.constant 0 : index
    %c7 = arith.constant 7 : index
    %95 = vector.load %arg10[%c0_53, %c7] : memref<8x32xf32, #tpu.memory_space<vmem>>, vector<8x1xf32>
    %c7_54 = arith.constant 7 : index
    %c0_55 = arith.constant 0 : index
    %96 = vector.load %arg11[%c7_54, %c0_55] : memref<32x128xf32, #tpu.memory_space<vmem>>, vector<1x128xf32>
    %97 = vector.broadcast %95 : vector<8x1xf32> to vector<8x128xf32>
    %98 = vector.broadcast %96 : vector<1x128xf32> to vector<8x128xf32>
    %99 = arith.addf %97, %98 : vector<8x128xf32>
    %cst_56 = arith.constant 0.000000e+00 : f32
    %100 = vector.broadcast %cst_56 : f32 to vector<8x128xf32>
    %101 = arith.maximumf %99, %100 : vector<8x128xf32>
    %c7_57 = arith.constant 7 : index
    %102 = memref.load %arg8[%c7_57] : memref<33xf32, #tpu.memory_space<smem>>
    %103 = vector.broadcast %102 : f32 to vector<8x128xf32>
    %104 = arith.mulf %101, %103 : vector<8x128xf32>
    %105 = arith.addf %94, %104 : vector<8x128xf32>
    %c0_58 = arith.constant 0 : index
    %c8 = arith.constant 8 : index
    %106 = vector.load %arg10[%c0_58, %c8] : memref<8x32xf32, #tpu.memory_space<vmem>>, vector<8x1xf32>
    %c8_59 = arith.constant 8 : index
    %c0_60 = arith.constant 0 : index
    %107 = vector.load %arg11[%c8_59, %c0_60] : memref<32x128xf32, #tpu.memory_space<vmem>>, vector<1x128xf32>
    %108 = vector.broadcast %106 : vector<8x1xf32> to vector<8x128xf32>
    %109 = vector.broadcast %107 : vector<1x128xf32> to vector<8x128xf32>
    %110 = arith.addf %108, %109 : vector<8x128xf32>
    %cst_61 = arith.constant 0.000000e+00 : f32
    %111 = vector.broadcast %cst_61 : f32 to vector<8x128xf32>
    %112 = arith.maximumf %110, %111 : vector<8x128xf32>
    %c8_62 = arith.constant 8 : index
    %113 = memref.load %arg8[%c8_62] : memref<33xf32, #tpu.memory_space<smem>>
    %114 = vector.broadcast %113 : f32 to vector<8x128xf32>
    %115 = arith.mulf %112, %114 : vector<8x128xf32>
    %116 = arith.addf %105, %115 : vector<8x128xf32>
    %c0_63 = arith.constant 0 : index
    %c9 = arith.constant 9 : index
    %117 = vector.load %arg10[%c0_63, %c9] : memref<8x32xf32, #tpu.memory_space<vmem>>, vector<8x1xf32>
    %c9_64 = arith.constant 9 : index
    %c0_65 = arith.constant 0 : index
    %118 = vector.load %arg11[%c9_64, %c0_65] : memref<32x128xf32, #tpu.memory_space<vmem>>, vector<1x128xf32>
    %119 = vector.broadcast %117 : vector<8x1xf32> to vector<8x128xf32>
    %120 = vector.broadcast %118 : vector<1x128xf32> to vector<8x128xf32>
    %121 = arith.addf %119, %120 : vector<8x128xf32>
    %cst_66 = arith.constant 0.000000e+00 : f32
    %122 = vector.broadcast %cst_66 : f32 to vector<8x128xf32>
    %123 = arith.maximumf %121, %122 : vector<8x128xf32>
    %c9_67 = arith.constant 9 : index
    %124 = memref.load %arg8[%c9_67] : memref<33xf32, #tpu.memory_space<smem>>
    %125 = vector.broadcast %124 : f32 to vector<8x128xf32>
    %126 = arith.mulf %123, %125 : vector<8x128xf32>
    %127 = arith.addf %116, %126 : vector<8x128xf32>
    %c0_68 = arith.constant 0 : index
    %c10 = arith.constant 10 : index
    %128 = vector.load %arg10[%c0_68, %c10] : memref<8x32xf32, #tpu.memory_space<vmem>>, vector<8x1xf32>
    %c10_69 = arith.constant 10 : index
    %c0_70 = arith.constant 0 : index
    %129 = vector.load %arg11[%c10_69, %c0_70] : memref<32x128xf32, #tpu.memory_space<vmem>>, vector<1x128xf32>
    %130 = vector.broadcast %128 : vector<8x1xf32> to vector<8x128xf32>
    %131 = vector.broadcast %129 : vector<1x128xf32> to vector<8x128xf32>
    %132 = arith.addf %130, %131 : vector<8x128xf32>
    %cst_71 = arith.constant 0.000000e+00 : f32
    %133 = vector.broadcast %cst_71 : f32 to vector<8x128xf32>
    %134 = arith.maximumf %132, %133 : vector<8x128xf32>
    %c10_72 = arith.constant 10 : index
    %135 = memref.load %arg8[%c10_72] : memref<33xf32, #tpu.memory_space<smem>>
    %136 = vector.broadcast %135 : f32 to vector<8x128xf32>
    %137 = arith.mulf %134, %136 : vector<8x128xf32>
    %138 = arith.addf %127, %137 : vector<8x128xf32>
    %c0_73 = arith.constant 0 : index
    %c11 = arith.constant 11 : index
    %139 = vector.load %arg10[%c0_73, %c11] : memref<8x32xf32, #tpu.memory_space<vmem>>, vector<8x1xf32>
    %c11_74 = arith.constant 11 : index
    %c0_75 = arith.constant 0 : index
    %140 = vector.load %arg11[%c11_74, %c0_75] : memref<32x128xf32, #tpu.memory_space<vmem>>, vector<1x128xf32>
    %141 = vector.broadcast %139 : vector<8x1xf32> to vector<8x128xf32>
    %142 = vector.broadcast %140 : vector<1x128xf32> to vector<8x128xf32>
    %143 = arith.addf %141, %142 : vector<8x128xf32>
    %cst_76 = arith.constant 0.000000e+00 : f32
    %144 = vector.broadcast %cst_76 : f32 to vector<8x128xf32>
    %145 = arith.maximumf %143, %144 : vector<8x128xf32>
    %c11_77 = arith.constant 11 : index
    %146 = memref.load %arg8[%c11_77] : memref<33xf32, #tpu.memory_space<smem>>
    %147 = vector.broadcast %146 : f32 to vector<8x128xf32>
    %148 = arith.mulf %145, %147 : vector<8x128xf32>
    %149 = arith.addf %138, %148 : vector<8x128xf32>
    %c0_78 = arith.constant 0 : index
    %c12 = arith.constant 12 : index
    %150 = vector.load %arg10[%c0_78, %c12] : memref<8x32xf32, #tpu.memory_space<vmem>>, vector<8x1xf32>
    %c12_79 = arith.constant 12 : index
    %c0_80 = arith.constant 0 : index
    %151 = vector.load %arg11[%c12_79, %c0_80] : memref<32x128xf32, #tpu.memory_space<vmem>>, vector<1x128xf32>
    %152 = vector.broadcast %150 : vector<8x1xf32> to vector<8x128xf32>
    %153 = vector.broadcast %151 : vector<1x128xf32> to vector<8x128xf32>
    %154 = arith.addf %152, %153 : vector<8x128xf32>
    %cst_81 = arith.constant 0.000000e+00 : f32
    %155 = vector.broadcast %cst_81 : f32 to vector<8x128xf32>
    %156 = arith.maximumf %154, %155 : vector<8x128xf32>
    %c12_82 = arith.constant 12 : index
    %157 = memref.load %arg8[%c12_82] : memref<33xf32, #tpu.memory_space<smem>>
    %158 = vector.broadcast %157 : f32 to vector<8x128xf32>
    %159 = arith.mulf %156, %158 : vector<8x128xf32>
    %160 = arith.addf %149, %159 : vector<8x128xf32>
    %c0_83 = arith.constant 0 : index
    %c13 = arith.constant 13 : index
    %161 = vector.load %arg10[%c0_83, %c13] : memref<8x32xf32, #tpu.memory_space<vmem>>, vector<8x1xf32>
    %c13_84 = arith.constant 13 : index
    %c0_85 = arith.constant 0 : index
    %162 = vector.load %arg11[%c13_84, %c0_85] : memref<32x128xf32, #tpu.memory_space<vmem>>, vector<1x128xf32>
    %163 = vector.broadcast %161 : vector<8x1xf32> to vector<8x128xf32>
    %164 = vector.broadcast %162 : vector<1x128xf32> to vector<8x128xf32>
    %165 = arith.addf %163, %164 : vector<8x128xf32>
    %cst_86 = arith.constant 0.000000e+00 : f32
    %166 = vector.broadcast %cst_86 : f32 to vector<8x128xf32>
    %167 = arith.maximumf %165, %166 : vector<8x128xf32>
    %c13_87 = arith.constant 13 : index
    %168 = memref.load %arg8[%c13_87] : memref<33xf32, #tpu.memory_space<smem>>
    %169 = vector.broadcast %168 : f32 to vector<8x128xf32>
    %170 = arith.mulf %167, %169 : vector<8x128xf32>
    %171 = arith.addf %160, %170 : vector<8x128xf32>
    %c0_88 = arith.constant 0 : index
    %c14 = arith.constant 14 : index
    %172 = vector.load %arg10[%c0_88, %c14] : memref<8x32xf32, #tpu.memory_space<vmem>>, vector<8x1xf32>
    %c14_89 = arith.constant 14 : index
    %c0_90 = arith.constant 0 : index
    %173 = vector.load %arg11[%c14_89, %c0_90] : memref<32x128xf32, #tpu.memory_space<vmem>>, vector<1x128xf32>
    %174 = vector.broadcast %172 : vector<8x1xf32> to vector<8x128xf32>
    %175 = vector.broadcast %173 : vector<1x128xf32> to vector<8x128xf32>
    %176 = arith.addf %174, %175 : vector<8x128xf32>
    %cst_91 = arith.constant 0.000000e+00 : f32
    %177 = vector.broadcast %cst_91 : f32 to vector<8x128xf32>
    %178 = arith.maximumf %176, %177 : vector<8x128xf32>
    %c14_92 = arith.constant 14 : index
    %179 = memref.load %arg8[%c14_92] : memref<33xf32, #tpu.memory_space<smem>>
    %180 = vector.broadcast %179 : f32 to vector<8x128xf32>
    %181 = arith.mulf %178, %180 : vector<8x128xf32>
    %182 = arith.addf %171, %181 : vector<8x128xf32>
    %c0_93 = arith.constant 0 : index
    %c15 = arith.constant 15 : index
    %183 = vector.load %arg10[%c0_93, %c15] : memref<8x32xf32, #tpu.memory_space<vmem>>, vector<8x1xf32>
    %c15_94 = arith.constant 15 : index
    %c0_95 = arith.constant 0 : index
    %184 = vector.load %arg11[%c15_94, %c0_95] : memref<32x128xf32, #tpu.memory_space<vmem>>, vector<1x128xf32>
    %185 = vector.broadcast %183 : vector<8x1xf32> to vector<8x128xf32>
    %186 = vector.broadcast %184 : vector<1x128xf32> to vector<8x128xf32>
    %187 = arith.addf %185, %186 : vector<8x128xf32>
    %cst_96 = arith.constant 0.000000e+00 : f32
    %188 = vector.broadcast %cst_96 : f32 to vector<8x128xf32>
    %189 = arith.maximumf %187, %188 : vector<8x128xf32>
    %c15_97 = arith.constant 15 : index
    %190 = memref.load %arg8[%c15_97] : memref<33xf32, #tpu.memory_space<smem>>
    %191 = vector.broadcast %190 : f32 to vector<8x128xf32>
    %192 = arith.mulf %189, %191 : vector<8x128xf32>
    %193 = arith.addf %182, %192 : vector<8x128xf32>
    %c0_98 = arith.constant 0 : index
    %c16 = arith.constant 16 : index
    %194 = vector.load %arg10[%c0_98, %c16] : memref<8x32xf32, #tpu.memory_space<vmem>>, vector<8x1xf32>
    %c16_99 = arith.constant 16 : index
    %c0_100 = arith.constant 0 : index
    %195 = vector.load %arg11[%c16_99, %c0_100] : memref<32x128xf32, #tpu.memory_space<vmem>>, vector<1x128xf32>
    %196 = vector.broadcast %194 : vector<8x1xf32> to vector<8x128xf32>
    %197 = vector.broadcast %195 : vector<1x128xf32> to vector<8x128xf32>
    %198 = arith.addf %196, %197 : vector<8x128xf32>
    %cst_101 = arith.constant 0.000000e+00 : f32
    %199 = vector.broadcast %cst_101 : f32 to vector<8x128xf32>
    %200 = arith.maximumf %198, %199 : vector<8x128xf32>
    %c16_102 = arith.constant 16 : index
    %201 = memref.load %arg8[%c16_102] : memref<33xf32, #tpu.memory_space<smem>>
    %202 = vector.broadcast %201 : f32 to vector<8x128xf32>
    %203 = arith.mulf %200, %202 : vector<8x128xf32>
    %204 = arith.addf %193, %203 : vector<8x128xf32>
    %c0_103 = arith.constant 0 : index
    %c17 = arith.constant 17 : index
    %205 = vector.load %arg10[%c0_103, %c17] : memref<8x32xf32, #tpu.memory_space<vmem>>, vector<8x1xf32>
    %c17_104 = arith.constant 17 : index
    %c0_105 = arith.constant 0 : index
    %206 = vector.load %arg11[%c17_104, %c0_105] : memref<32x128xf32, #tpu.memory_space<vmem>>, vector<1x128xf32>
    %207 = vector.broadcast %205 : vector<8x1xf32> to vector<8x128xf32>
    %208 = vector.broadcast %206 : vector<1x128xf32> to vector<8x128xf32>
    %209 = arith.addf %207, %208 : vector<8x128xf32>
    %cst_106 = arith.constant 0.000000e+00 : f32
    %210 = vector.broadcast %cst_106 : f32 to vector<8x128xf32>
    %211 = arith.maximumf %209, %210 : vector<8x128xf32>
    %c17_107 = arith.constant 17 : index
    %212 = memref.load %arg8[%c17_107] : memref<33xf32, #tpu.memory_space<smem>>
    %213 = vector.broadcast %212 : f32 to vector<8x128xf32>
    %214 = arith.mulf %211, %213 : vector<8x128xf32>
    %215 = arith.addf %204, %214 : vector<8x128xf32>
    %c0_108 = arith.constant 0 : index
    %c18 = arith.constant 18 : index
    %216 = vector.load %arg10[%c0_108, %c18] : memref<8x32xf32, #tpu.memory_space<vmem>>, vector<8x1xf32>
    %c18_109 = arith.constant 18 : index
    %c0_110 = arith.constant 0 : index
    %217 = vector.load %arg11[%c18_109, %c0_110] : memref<32x128xf32, #tpu.memory_space<vmem>>, vector<1x128xf32>
    %218 = vector.broadcast %216 : vector<8x1xf32> to vector<8x128xf32>
    %219 = vector.broadcast %217 : vector<1x128xf32> to vector<8x128xf32>
    %220 = arith.addf %218, %219 : vector<8x128xf32>
    %cst_111 = arith.constant 0.000000e+00 : f32
    %221 = vector.broadcast %cst_111 : f32 to vector<8x128xf32>
    %222 = arith.maximumf %220, %221 : vector<8x128xf32>
    %c18_112 = arith.constant 18 : index
    %223 = memref.load %arg8[%c18_112] : memref<33xf32, #tpu.memory_space<smem>>
    %224 = vector.broadcast %223 : f32 to vector<8x128xf32>
    %225 = arith.mulf %222, %224 : vector<8x128xf32>
    %226 = arith.addf %215, %225 : vector<8x128xf32>
    %c0_113 = arith.constant 0 : index
    %c19 = arith.constant 19 : index
    %227 = vector.load %arg10[%c0_113, %c19] : memref<8x32xf32, #tpu.memory_space<vmem>>, vector<8x1xf32>
    %c19_114 = arith.constant 19 : index
    %c0_115 = arith.constant 0 : index
    %228 = vector.load %arg11[%c19_114, %c0_115] : memref<32x128xf32, #tpu.memory_space<vmem>>, vector<1x128xf32>
    %229 = vector.broadcast %227 : vector<8x1xf32> to vector<8x128xf32>
    %230 = vector.broadcast %228 : vector<1x128xf32> to vector<8x128xf32>
    %231 = arith.addf %229, %230 : vector<8x128xf32>
    %cst_116 = arith.constant 0.000000e+00 : f32
    %232 = vector.broadcast %cst_116 : f32 to vector<8x128xf32>
    %233 = arith.maximumf %231, %232 : vector<8x128xf32>
    %c19_117 = arith.constant 19 : index
    %234 = memref.load %arg8[%c19_117] : memref<33xf32, #tpu.memory_space<smem>>
    %235 = vector.broadcast %234 : f32 to vector<8x128xf32>
    %236 = arith.mulf %233, %235 : vector<8x128xf32>
    %237 = arith.addf %226, %236 : vector<8x128xf32>
    %c0_118 = arith.constant 0 : index
    %c20 = arith.constant 20 : index
    %238 = vector.load %arg10[%c0_118, %c20] : memref<8x32xf32, #tpu.memory_space<vmem>>, vector<8x1xf32>
    %c20_119 = arith.constant 20 : index
    %c0_120 = arith.constant 0 : index
    %239 = vector.load %arg11[%c20_119, %c0_120] : memref<32x128xf32, #tpu.memory_space<vmem>>, vector<1x128xf32>
    %240 = vector.broadcast %238 : vector<8x1xf32> to vector<8x128xf32>
    %241 = vector.broadcast %239 : vector<1x128xf32> to vector<8x128xf32>
    %242 = arith.addf %240, %241 : vector<8x128xf32>
    %cst_121 = arith.constant 0.000000e+00 : f32
    %243 = vector.broadcast %cst_121 : f32 to vector<8x128xf32>
    %244 = arith.maximumf %242, %243 : vector<8x128xf32>
    %c20_122 = arith.constant 20 : index
    %245 = memref.load %arg8[%c20_122] : memref<33xf32, #tpu.memory_space<smem>>
    %246 = vector.broadcast %245 : f32 to vector<8x128xf32>
    %247 = arith.mulf %244, %246 : vector<8x128xf32>
    %248 = arith.addf %237, %247 : vector<8x128xf32>
    %c0_123 = arith.constant 0 : index
    %c21 = arith.constant 21 : index
    %249 = vector.load %arg10[%c0_123, %c21] : memref<8x32xf32, #tpu.memory_space<vmem>>, vector<8x1xf32>
    %c21_124 = arith.constant 21 : index
    %c0_125 = arith.constant 0 : index
    %250 = vector.load %arg11[%c21_124, %c0_125] : memref<32x128xf32, #tpu.memory_space<vmem>>, vector<1x128xf32>
    %251 = vector.broadcast %249 : vector<8x1xf32> to vector<8x128xf32>
    %252 = vector.broadcast %250 : vector<1x128xf32> to vector<8x128xf32>
    %253 = arith.addf %251, %252 : vector<8x128xf32>
    %cst_126 = arith.constant 0.000000e+00 : f32
    %254 = vector.broadcast %cst_126 : f32 to vector<8x128xf32>
    %255 = arith.maximumf %253, %254 : vector<8x128xf32>
    %c21_127 = arith.constant 21 : index
    %256 = memref.load %arg8[%c21_127] : memref<33xf32, #tpu.memory_space<smem>>
    %257 = vector.broadcast %256 : f32 to vector<8x128xf32>
    %258 = arith.mulf %255, %257 : vector<8x128xf32>
    %259 = arith.addf %248, %258 : vector<8x128xf32>
    %c0_128 = arith.constant 0 : index
    %c22 = arith.constant 22 : index
    %260 = vector.load %arg10[%c0_128, %c22] : memref<8x32xf32, #tpu.memory_space<vmem>>, vector<8x1xf32>
    %c22_129 = arith.constant 22 : index
    %c0_130 = arith.constant 0 : index
    %261 = vector.load %arg11[%c22_129, %c0_130] : memref<32x128xf32, #tpu.memory_space<vmem>>, vector<1x128xf32>
    %262 = vector.broadcast %260 : vector<8x1xf32> to vector<8x128xf32>
    %263 = vector.broadcast %261 : vector<1x128xf32> to vector<8x128xf32>
    %264 = arith.addf %262, %263 : vector<8x128xf32>
    %cst_131 = arith.constant 0.000000e+00 : f32
    %265 = vector.broadcast %cst_131 : f32 to vector<8x128xf32>
    %266 = arith.maximumf %264, %265 : vector<8x128xf32>
    %c22_132 = arith.constant 22 : index
    %267 = memref.load %arg8[%c22_132] : memref<33xf32, #tpu.memory_space<smem>>
    %268 = vector.broadcast %267 : f32 to vector<8x128xf32>
    %269 = arith.mulf %266, %268 : vector<8x128xf32>
    %270 = arith.addf %259, %269 : vector<8x128xf32>
    %c0_133 = arith.constant 0 : index
    %c23 = arith.constant 23 : index
    %271 = vector.load %arg10[%c0_133, %c23] : memref<8x32xf32, #tpu.memory_space<vmem>>, vector<8x1xf32>
    %c23_134 = arith.constant 23 : index
    %c0_135 = arith.constant 0 : index
    %272 = vector.load %arg11[%c23_134, %c0_135] : memref<32x128xf32, #tpu.memory_space<vmem>>, vector<1x128xf32>
    %273 = vector.broadcast %271 : vector<8x1xf32> to vector<8x128xf32>
    %274 = vector.broadcast %272 : vector<1x128xf32> to vector<8x128xf32>
    %275 = arith.addf %273, %274 : vector<8x128xf32>
    %cst_136 = arith.constant 0.000000e+00 : f32
    %276 = vector.broadcast %cst_136 : f32 to vector<8x128xf32>
    %277 = arith.maximumf %275, %276 : vector<8x128xf32>
    %c23_137 = arith.constant 23 : index
    %278 = memref.load %arg8[%c23_137] : memref<33xf32, #tpu.memory_space<smem>>
    %279 = vector.broadcast %278 : f32 to vector<8x128xf32>
    %280 = arith.mulf %277, %279 : vector<8x128xf32>
    %281 = arith.addf %270, %280 : vector<8x128xf32>
    %c0_138 = arith.constant 0 : index
    %c24 = arith.constant 24 : index
    %282 = vector.load %arg10[%c0_138, %c24] : memref<8x32xf32, #tpu.memory_space<vmem>>, vector<8x1xf32>
    %c24_139 = arith.constant 24 : index
    %c0_140 = arith.constant 0 : index
    %283 = vector.load %arg11[%c24_139, %c0_140] : memref<32x128xf32, #tpu.memory_space<vmem>>, vector<1x128xf32>
    %284 = vector.broadcast %282 : vector<8x1xf32> to vector<8x128xf32>
    %285 = vector.broadcast %283 : vector<1x128xf32> to vector<8x128xf32>
    %286 = arith.addf %284, %285 : vector<8x128xf32>
    %cst_141 = arith.constant 0.000000e+00 : f32
    %287 = vector.broadcast %cst_141 : f32 to vector<8x128xf32>
    %288 = arith.maximumf %286, %287 : vector<8x128xf32>
    %c24_142 = arith.constant 24 : index
    %289 = memref.load %arg8[%c24_142] : memref<33xf32, #tpu.memory_space<smem>>
    %290 = vector.broadcast %289 : f32 to vector<8x128xf32>
    %291 = arith.mulf %288, %290 : vector<8x128xf32>
    %292 = arith.addf %281, %291 : vector<8x128xf32>
    %c0_143 = arith.constant 0 : index
    %c25 = arith.constant 25 : index
    %293 = vector.load %arg10[%c0_143, %c25] : memref<8x32xf32, #tpu.memory_space<vmem>>, vector<8x1xf32>
    %c25_144 = arith.constant 25 : index
    %c0_145 = arith.constant 0 : index
    %294 = vector.load %arg11[%c25_144, %c0_145] : memref<32x128xf32, #tpu.memory_space<vmem>>, vector<1x128xf32>
    %295 = vector.broadcast %293 : vector<8x1xf32> to vector<8x128xf32>
    %296 = vector.broadcast %294 : vector<1x128xf32> to vector<8x128xf32>
    %297 = arith.addf %295, %296 : vector<8x128xf32>
    %cst_146 = arith.constant 0.000000e+00 : f32
    %298 = vector.broadcast %cst_146 : f32 to vector<8x128xf32>
    %299 = arith.maximumf %297, %298 : vector<8x128xf32>
    %c25_147 = arith.constant 25 : index
    %300 = memref.load %arg8[%c25_147] : memref<33xf32, #tpu.memory_space<smem>>
    %301 = vector.broadcast %300 : f32 to vector<8x128xf32>
    %302 = arith.mulf %299, %301 : vector<8x128xf32>
    %303 = arith.addf %292, %302 : vector<8x128xf32>
    %c0_148 = arith.constant 0 : index
    %c26 = arith.constant 26 : index
    %304 = vector.load %arg10[%c0_148, %c26] : memref<8x32xf32, #tpu.memory_space<vmem>>, vector<8x1xf32>
    %c26_149 = arith.constant 26 : index
    %c0_150 = arith.constant 0 : index
    %305 = vector.load %arg11[%c26_149, %c0_150] : memref<32x128xf32, #tpu.memory_space<vmem>>, vector<1x128xf32>
    %306 = vector.broadcast %304 : vector<8x1xf32> to vector<8x128xf32>
    %307 = vector.broadcast %305 : vector<1x128xf32> to vector<8x128xf32>
    %308 = arith.addf %306, %307 : vector<8x128xf32>
    %cst_151 = arith.constant 0.000000e+00 : f32
    %309 = vector.broadcast %cst_151 : f32 to vector<8x128xf32>
    %310 = arith.maximumf %308, %309 : vector<8x128xf32>
    %c26_152 = arith.constant 26 : index
    %311 = memref.load %arg8[%c26_152] : memref<33xf32, #tpu.memory_space<smem>>
    %312 = vector.broadcast %311 : f32 to vector<8x128xf32>
    %313 = arith.mulf %310, %312 : vector<8x128xf32>
    %314 = arith.addf %303, %313 : vector<8x128xf32>
    %c0_153 = arith.constant 0 : index
    %c27 = arith.constant 27 : index
    %315 = vector.load %arg10[%c0_153, %c27] : memref<8x32xf32, #tpu.memory_space<vmem>>, vector<8x1xf32>
    %c27_154 = arith.constant 27 : index
    %c0_155 = arith.constant 0 : index
    %316 = vector.load %arg11[%c27_154, %c0_155] : memref<32x128xf32, #tpu.memory_space<vmem>>, vector<1x128xf32>
    %317 = vector.broadcast %315 : vector<8x1xf32> to vector<8x128xf32>
    %318 = vector.broadcast %316 : vector<1x128xf32> to vector<8x128xf32>
    %319 = arith.addf %317, %318 : vector<8x128xf32>
    %cst_156 = arith.constant 0.000000e+00 : f32
    %320 = vector.broadcast %cst_156 : f32 to vector<8x128xf32>
    %321 = arith.maximumf %319, %320 : vector<8x128xf32>
    %c27_157 = arith.constant 27 : index
    %322 = memref.load %arg8[%c27_157] : memref<33xf32, #tpu.memory_space<smem>>
    %323 = vector.broadcast %322 : f32 to vector<8x128xf32>
    %324 = arith.mulf %321, %323 : vector<8x128xf32>
    %325 = arith.addf %314, %324 : vector<8x128xf32>
    %c0_158 = arith.constant 0 : index
    %c28 = arith.constant 28 : index
    %326 = vector.load %arg10[%c0_158, %c28] : memref<8x32xf32, #tpu.memory_space<vmem>>, vector<8x1xf32>
    %c28_159 = arith.constant 28 : index
    %c0_160 = arith.constant 0 : index
    %327 = vector.load %arg11[%c28_159, %c0_160] : memref<32x128xf32, #tpu.memory_space<vmem>>, vector<1x128xf32>
    %328 = vector.broadcast %326 : vector<8x1xf32> to vector<8x128xf32>
    %329 = vector.broadcast %327 : vector<1x128xf32> to vector<8x128xf32>
    %330 = arith.addf %328, %329 : vector<8x128xf32>
    %cst_161 = arith.constant 0.000000e+00 : f32
    %331 = vector.broadcast %cst_161 : f32 to vector<8x128xf32>
    %332 = arith.maximumf %330, %331 : vector<8x128xf32>
    %c28_162 = arith.constant 28 : index
    %333 = memref.load %arg8[%c28_162] : memref<33xf32, #tpu.memory_space<smem>>
    %334 = vector.broadcast %333 : f32 to vector<8x128xf32>
    %335 = arith.mulf %332, %334 : vector<8x128xf32>
    %336 = arith.addf %325, %335 : vector<8x128xf32>
    %c0_163 = arith.constant 0 : index
    %c29 = arith.constant 29 : index
    %337 = vector.load %arg10[%c0_163, %c29] : memref<8x32xf32, #tpu.memory_space<vmem>>, vector<8x1xf32>
    %c29_164 = arith.constant 29 : index
    %c0_165 = arith.constant 0 : index
    %338 = vector.load %arg11[%c29_164, %c0_165] : memref<32x128xf32, #tpu.memory_space<vmem>>, vector<1x128xf32>
    %339 = vector.broadcast %337 : vector<8x1xf32> to vector<8x128xf32>
    %340 = vector.broadcast %338 : vector<1x128xf32> to vector<8x128xf32>
    %341 = arith.addf %339, %340 : vector<8x128xf32>
    %cst_166 = arith.constant 0.000000e+00 : f32
    %342 = vector.broadcast %cst_166 : f32 to vector<8x128xf32>
    %343 = arith.maximumf %341, %342 : vector<8x128xf32>
    %c29_167 = arith.constant 29 : index
    %344 = memref.load %arg8[%c29_167] : memref<33xf32, #tpu.memory_space<smem>>
    %345 = vector.broadcast %344 : f32 to vector<8x128xf32>
    %346 = arith.mulf %343, %345 : vector<8x128xf32>
    %347 = arith.addf %336, %346 : vector<8x128xf32>
    %c0_168 = arith.constant 0 : index
    %c30 = arith.constant 30 : index
    %348 = vector.load %arg10[%c0_168, %c30] : memref<8x32xf32, #tpu.memory_space<vmem>>, vector<8x1xf32>
    %c30_169 = arith.constant 30 : index
    %c0_170 = arith.constant 0 : index
    %349 = vector.load %arg11[%c30_169, %c0_170] : memref<32x128xf32, #tpu.memory_space<vmem>>, vector<1x128xf32>
    %350 = vector.broadcast %348 : vector<8x1xf32> to vector<8x128xf32>
    %351 = vector.broadcast %349 : vector<1x128xf32> to vector<8x128xf32>
    %352 = arith.addf %350, %351 : vector<8x128xf32>
    %cst_171 = arith.constant 0.000000e+00 : f32
    %353 = vector.broadcast %cst_171 : f32 to vector<8x128xf32>
    %354 = arith.maximumf %352, %353 : vector<8x128xf32>
    %c30_172 = arith.constant 30 : index
    %355 = memref.load %arg8[%c30_172] : memref<33xf32, #tpu.memory_space<smem>>
    %356 = vector.broadcast %355 : f32 to vector<8x128xf32>
    %357 = arith.mulf %354, %356 : vector<8x128xf32>
    %358 = arith.addf %347, %357 : vector<8x128xf32>
    %c0_173 = arith.constant 0 : index
    %c31 = arith.constant 31 : index
    %359 = vector.load %arg10[%c0_173, %c31] : memref<8x32xf32, #tpu.memory_space<vmem>>, vector<8x1xf32>
    %c31_174 = arith.constant 31 : index
    %c0_175 = arith.constant 0 : index
    %360 = vector.load %arg11[%c31_174, %c0_175] : memref<32x128xf32, #tpu.memory_space<vmem>>, vector<1x128xf32>
    %361 = vector.broadcast %359 : vector<8x1xf32> to vector<8x128xf32>
    %362 = vector.broadcast %360 : vector<1x128xf32> to vector<8x128xf32>
    %363 = arith.addf %361, %362 : vector<8x128xf32>
    %cst_176 = arith.constant 0.000000e+00 : f32
    %364 = vector.broadcast %cst_176 : f32 to vector<8x128xf32>
    %365 = arith.maximumf %363, %364 : vector<8x128xf32>
    %c31_177 = arith.constant 31 : index
    %366 = memref.load %arg8[%c31_177] : memref<33xf32, #tpu.memory_space<smem>>
    %367 = vector.broadcast %366 : f32 to vector<8x128xf32>
    %368 = arith.mulf %365, %367 : vector<8x128xf32>
    %369 = arith.addf %358, %368 : vector<8x128xf32>
    %370 = arith.negf %369 : vector<8x128xf32>
    %371 = math.exp %370 : vector<8x128xf32>
    %cst_178 = arith.constant 1.000000e+00 : f32
    %372 = vector.broadcast %cst_178 : f32 to vector<8x128xf32>
    %373 = arith.addf %372, %371 : vector<8x128xf32>
    %374 = arith.divf %372, %373 : vector<8x128xf32>
    %c0_179 = arith.constant 0 : index
    %c0_180 = arith.constant 0 : index
    %375 = vector.load %arg9[%c0_179, %c0_180] : memref<8x128xf32, #tpu.memory_space<vmem>>, vector<8x128xf32>
    tpu.vector_store %arg9[%c0_179, %c0_180], %374 {strides = array<i32>} : memref<8x128xf32, #tpu.memory_space<vmem>>, vector<8x128xf32>,
    return
  }
  func.func @transform_0(%arg0: i32, %arg1: i32) -> (i32, i32) {
    %c0_i32 = arith.constant 0 : i32
    %c0_i32_0 = arith.constant 0 : i32
    return %arg0, %c0_i32 : i32, i32
  }
  func.func @transform_1(%arg0: i32, %arg1: i32) -> (i32, i32) {
    %c0_i32 = arith.constant 0 : i32
    %c0_i32_0 = arith.constant 0 : i32
    return %c0_i32, %arg1 : i32, i32
  }
  func.func @transform_2(%arg0: i32, %arg1: i32) -> (i32, i32) {
    %c0_i32 = arith.constant 0 : i32
    %c0_i32_0 = arith.constant 0 : i32
    %c0_i32_1 = arith.constant 0 : i32
    return %c0_i32, %c0_i32_0 : i32, i32
  }
  func.func @transform_3(%arg0: i32, %arg1: i32) -> (i32, i32) {
    %c0_i32 = arith.constant 0 : i32
    %c0_i32_0 = arith.constant 0 : i32
    %c0_i32_1 = arith.constant 0 : i32
    return %c0_i32, %c0_i32_0 : i32, i32
  }
  func.func @transform_4(%arg0: i32, %arg1: i32) -> (i32, i32) {
    %c0_i32 = arith.constant 0 : i32
    %c0_i32_0 = arith.constant 0 : i32
    %c0_i32_1 = arith.constant 0 : i32
    return %c0_i32, %c0_i32_0 : i32, i32
  }
  func.func @transform_5(%arg0: i32, %arg1: i32) -> (i32, i32) {
    %c0_i32 = arith.constant 0 : i32
    %c0_i32_0 = arith.constant 0 : i32
    %c0_i32_1 = arith.constant 0 : i32
    return %c0_i32, %c0_i32_0 : i32, i32
  }
  func.func @transform_6(%arg0: i32, %arg1: i32) -> i32 {
    %c0_i32 = arith.constant 0 : i32
    %c0_i32_0 = arith.constant 0 : i32
    return %c0_i32 : i32
  }
  func.func @transform_7(%arg0: i32, %arg1: i32) -> (i32, i32) {
    %c0_i32 = arith.constant 0 : i32
    return %arg0, %arg1 : i32, i32
  }
}

</mosaic_0001>

<bundles_post_ra>
// kernel: tpu_custom_call.1
= control target key start
LH: loop header
LB: loop body
LE: loop exit
PB: predicated region body
PF: predicated region fallthrough
CT: control target
= control target key end

     0   :  { %12 = vsyncpa [#allocation5], 0  ;;  %s1262_s0 = inlined_call_operand.hbm [shape: f32[8,32], index: 0, kind: input, shape index: {}]   ;;  %s1263_s1 = inlined_call_operand.vmem [shape: f32[32,128], index: 1, kind: input, shape index: {}]   ;;  %s1264_s2 = inlined_call_operand.hbm [shape: f32[32,32], index: 2, kind: input, shape index: {}]   ;;  %s1265_s3 = inlined_call_operand.vmem [shape: f32[1,32], index: 3, kind: input, shape index: {}]   ;;  %s1266_s4 = inlined_call_operand.hbm [shape: f32[32,32], index: 4, kind: input, shape index: {}]   ;;  %s1267_s5 = inlined_call_operand.vmem [shape: f32[32,1], index: 5, kind: input, shape index: {}]   ;;  %s1268_s6 = inlined_call_operand.vmem [shape: f32[33], index: 6, kind: input, shape index: {}]   ;;  %s1269_s7 = inlined_call_operand.hbm [shape: f32[8,128], index: 7, kind: output, shape index: {}]  }
   0x1   :  { %13 = vsyncpa [#allocation9], 0 }
   0x2   :  { %14 = vsyncpa [#allocation7], 0 }
   0x3   :  { %15 = vsyncpa [#allocation6], 0  ;;  %s1096_s24 = smov [#allocation8]  }
   0x4   :  { %s33_s25 = sshll.u32 %s1096_s24, 4  ;;  %s34_s25 = int_to_ptr.vmem [resolvable:$true] %s33_s25 }
   0x5   :  { %s1004_s26 = scalar_lea.vmem %s34_s25, 512  ;;  %p1009_p1 = scmp.lt.s32.totalorder %s34_s25, %s34_s25 }
   0x6   :  { %p1005_p0 = scmp.ne.s32.totalorder %s34_s25, %s1004_s26  ;;  %p1010_p2 = scmp.lt.s32.totalorder %s1004_s26, %s1004_s26 }
   0x8   :  { %p1011_p3 = por %p1010_p2, %p1009_p1 }
   0xa   :  { %p1012_p4 = pnand %p1011_p3, %p1005_p0 }
   0xc   :  { %1015 = shalt.err (!%p1012_p4)
}
   0xd   :  { %s1097_s27 = smov 128   ;;  %s1098_s28 = smov 8  }
   0xe   :  { %39 = dma.hbm_to_vmem [thread:$0]  %s1264_s2, 512, %s34_s25, [#allocation9], %s1097_s27, %s1097_s27, %s1098_s28  }
   0xf   :  { %s1099_s8 = smov [#allocation4]   ;;  %s1100_s10 = smov [#allocation10]  }
  0x10   :  { %s22_s9 = sshll.u32 %s1099_s8, 4  ;;  %s47_s11 = sshll.u32 %s1100_s10, 4  ;;  %s23_s9 = int_to_ptr.vmem [resolvable:$true] %s22_s9  ;;  %s48_s11 = int_to_ptr.vmem [resolvable:$true] %s47_s11 }
  0x11   :  { %s1024_s12 = scalar_lea.vmem %s23_s9, 128  ;;  %p1029_p6 = scmp.lt.s32.totalorder %s23_s9, %s23_s9 }
  0x12   :  { %p1025_p5 = scmp.ne.s32.totalorder %s23_s9, %s1024_s12  ;;  %p1030_p7 = scmp.lt.s32.totalorder %s1024_s12, %s1024_s12 }
  0x14   :  { %p1031_p8 = por %p1030_p7, %p1029_p6 }
  0x16   :  { %p1032_p9 = pnand %p1031_p8, %p1025_p5 }
  0x18   :  { %1035 = shalt.err (!%p1032_p9)
}
  0x19   :  { %25 = dma.hbm_to_vmem [thread:$0]  %s1262_s0, 128, %s23_s9, [#allocation5]  }
  0x1a   :  { %s62_s2 = sshll.u32 %s1268_s6, 4  ;;  %s1044_s17 = scalar_lea.vmem %s48_s11, 512  ;;  %s63_s2 = int_to_ptr.vmem [resolvable:$true] %s62_s2 }
  0x1b   :  { %p1045_p10 = scmp.ne.s32.totalorder %s48_s11, %s1044_s17  ;;  %p1049_p11 = scmp.lt.s32.totalorder %s48_s11, %s48_s11 }
  0x1c   :  { %p1050_p12 = scmp.lt.s32.totalorder %s1044_s17, %s1044_s17 }
  0x1e   :  { %p1051_p13 = por %p1050_p12, %p1049_p11 }
  0x20   :  { %p1052_p0 = pnand %p1051_p13, %p1045_p10 }
  0x22   :  { %1055 = shalt.err (!%p1052_p0)
}
  0x23   :  { %53 = dma.hbm_to_vmem [thread:$0]  %s1266_s4, 512, %s48_s11, [#allocation9], %s1097_s27, %s1097_s27, %s1098_s28  }
  0x24   :  { %s1056_s20 = scalar_lea.vmem %s63_s2, 16  ;;  %p1061_p2 = scmp.lt.s32.totalorder %s63_s2, %s63_s2 }
  0x25   :  { %p1057_p1 = scmp.ne.s32.totalorder %s63_s2, %s1056_s20  ;;  %p1062_p3 = scmp.lt.s32.totalorder %s1056_s20, %s1056_s20 }
  0x27   :  { %p1063_p4 = por %p1062_p3, %p1061_p2 }
  0x29   :  { %p1064_p5 = pnand %p1063_p4, %p1057_p1 }
  0x2b   :  { %1067 = shalt.err (!%p1064_p5)
}
  0x2c   :  { %s1101_s0 = smov [#allocation11]  }
  0x2d   :  { %65 = dma.vmem_to_smem %s63_s2, 16, %s1101_s0, [#allocation7]  }
  0x2e   :  { %1088 = dma.done.wait [#allocation5], 128  }
  0x2f   :  { %1089 = vsyncadd [#allocation5], 4294967168 }
  0x30   :  { %1090 = dma.done.wait [#allocation9], 1024  }
  0x31   :  { %1091 = vsyncadd [#allocation9], 4294966272 }
  0x32   :  { %1092 = dma.done.wait [#allocation7], 16  }
  0x33   :  { %1093 = vsyncadd [#allocation7], 4294967280 }
  0x34   :  { %78 = sfence }
  0x35   :  { %v83_v0 = vld [vmem:[#allocation8 + $0x18] sm:$0xff]  ;;  %v1102_v1 = vmov 0.0   ;;  %v82_v2 = vld [vmem:[#allocation8 + $0x10] sm:$0xff]  ;;  %vm1103_vm0 = vmmov 0   ;;  %v173_v3 = vld [vmem:[%s1263_s1 + $0x18] sm:$0xff]  ;;  %vm91_vm1 = vcmask 261120  }
  0x36   :  { %892 = vmatprep.subr.mxu0 %v1102_v1  ;;  %900 = vmatprep.mubr.msk.f32.mxu0 %vm1103_vm0, %v1102_v1  ;;  %v172_v4 = vld [vmem:[%s1263_s1 + $0x10] sm:$0xff]  ;;  %v81_v5 = vld [vmem:[#allocation8 + $0x8] sm:$0xff]  ;;  %v171_v6 = vld [vmem:[%s1263_s1 + $0x8] sm:$0xff]  ;;  %v1104_v14 = vmov 0   ;;  %v1105_v19 = vmov 1   ;;  %v1106_v37 = vmov 2  }
  0x37   :  { %893 = vmatpush3.msra.mxu0 %v83_v0  ;;  %903 = vmatprep.subr.mxu1 %v173_v3  ;;  %v80_v7 = vld [vmem:[#allocation8] sm:$0xff]  ;;  %v170_v8 = vld [vmem:[%s1263_s1] sm:$0xff]  ;;  %v79_v9 = vld [vmem:[#allocation4] sm:$0xff]  ;;  %v1107_v38 = vmov 4   ;;  %v1108_v39 = vmov 3   ;;  %v1109_v40 = vmov 7  }
  0x38   :  { %894 = vmatprep.subr.mxu0 %v1102_v1  ;;  %904 = vmatpush3.msra.mxu1 %v173_v3  ;;  %v166_v10 = vld [vmem:[#allocation10] sm:$0xff]  ;;  %v167_v11 = vld [vmem:[#allocation10 + $0x8] sm:$0xff]  ;;  %v168_v13 = vld [vmem:[#allocation10 + $0x10] sm:$0xff]  ;;  %v1110_v41 = vmov 5   ;;  %v1111_v42 = vmov 10   ;;  %v1112_v43 = vmov 6  }
  0x39   :  { %895 = vmatpush3.msra.mxu0 %v82_v2  ;;  %905 = vmatprep.subr.mxu1 %v172_v4  ;;  %v176_v12 = vld [vmem:[%s1267_s5 + $0x10] sm:$0xff]  ;;  %v169_v15 = vld [vmem:[#allocation10 + $0x18] sm:$0xff]  ;;  %v174_v16 = vld [vmem:[%s1267_s5] sm:$0xff]  ;;  %v1113_v44 = vmov 12   ;;  %v1114_v45 = vmov 8   ;;  %v1115_v46 = vmov 15  }
  0x3a   :  { %896 = vmatprep.subr.mxu0 %v1102_v1  ;;  %906 = vmatpush3.msra.mxu1 %v172_v4  ;;  %v177_v17 = vld [vmem:[%s1267_s5 + $0x18] sm:$0xff]  ;;  %v175_v18 = vld [vmem:[%s1267_s5 + $0x8] sm:$0xff]  ;;  %v808_v20 = vld [vmem:[%s1265_s3] ss:$0 sm:$0xff]  ;;  %v1116_v47 = vmov 9   ;;  %v1117_v48 = vmov 18  }
  0x3b   :  { %897 = vmatpush3.msra.mxu0 %v81_v5  ;;  %907 = vmatprep.subr.mxu1 %v171_v6  ;;  %v1118_v49 = vmov 11   ;;  %v1119_v50 = vmov 20   ;;  %v1120_v51 = vmov 13   ;;  %v1121_v52 = vmov 23   ;;  %s315_s3 = sld [smem:[#allocation11]] }
  0x3c   :  { %898 = vmatprep.subr.mxu0 %v1102_v1  ;;  %908 = vmatpush3.msra.mxu1 %v171_v6  ;;  %v1122_v53 = vmov 14   ;;  %v1123_v54 = vmov 26   ;;  %v1124_v55 = vmov 16   ;;  %v1125_v56 = vmov 29   ;;  %s814_s5 = sld [smem:[#allocation11 + $0x20]] }
  0x3d   :  { %899 = vmatpush3.msra.mxu0 %v80_v7  ;;  %909 = vmatprep.subr.mxu1 %v170_v8  ;;  %v1126_v57 = vmov 17   ;;  %v1127_v58 = vmov 31   ;;  %v1128_v59 = vmov 19   ;;  %v1129_v60 = vmov 21   ;;  %s817_s13 = sld [smem:[#allocation11 + $0x1]] }
  0x3e   :  { %901 = vmatmul.mubr.msk.f32.vlgmr.msra.gmra.mxu0 %vm91_vm1, %v79_v9  ;;  %910 = vmatpush3.msra.mxu1 %v170_v8  ;;  %v1130_v61 = vmov 22   ;;  %v1131_v62 = vmov 24   ;;  %v1132_v63 = vmov 25   ;;  %v1133_v0 = vmov 27   ;;  %s819_s14 = sld [smem:[#allocation11 + $0x2]] }
  0x3f   :  { %911 = vmatprep.mubr.msk.f32.mxu1 %vm91_vm1, %v166_v10  ;;  %959 = vset.pattern.permute.xlu1 %v1104_v14  ;;  %v1134_v1 = vmov 28   ;;  %v1135_v2 = vmov 30   ;;  %s821_s15 = sld [smem:[#allocation11 + $0x3]] }
  0x40   :  { %912 = vmatmul.mubr.msk.f32.vlgmr.msra.gmra.mxu1 %vm91_vm1, %v167_v11  ;;  %190 = vperm.xlu1 %959, %v176_v12   ;;  %s823_s16 = sld [smem:[#allocation11 + $0x4]] }
  0x41   :  { %914 = vmatprep.mubr.msk.f32.mxu1 %vm91_vm1, %v168_v13  ;;  %958 = vset.pattern.permute.xlu0 %v1104_v14  ;;  %v316_v9 = vstv %s315_s3  ;;  %s825_s2 = sld [smem:[#allocation11 + $0x5]] }
  0x42   :  { %180 = vperm.xlu0 %958, %v174_v16   ;;  %v300_v12 = vstv %s814_s5  ;;  %s827_s17 = sld [smem:[#allocation11 + $0x6]] }
  0x43   :  { %v331_v16 = vstv %s817_s13  ;;  %s829_s18 = sld [smem:[#allocation11 + $0x7]] }
  0x44   :  { %915 = vmatmul.mubr.msk.f32.gmra.mxu1 %vm91_vm1, %v169_v15  ;;  %195 = vperm.xlu1 %959, %v177_v17   ;;  %s831_s19 = sld [smem:[#allocation11 + $0x8]] }
  0x45   :  { %s833_s20 = sld [smem:[#allocation11 + $0x9]] }
  0x46   :  { %185 = vperm.xlu0 %958, %v175_v18   ;;  %s835_s0 = sld [smem:[#allocation11 + $0xa]] }
  0x47   :  { %s837_s4 = sld [smem:[#allocation11 + $0xb]] }
  0x48   :  { %960 = vset.pattern.permute.xlu1 %v1105_v19  ;;  %v346_v19 = vstv %s819_s14  ;;  %s1256_s6 = sld [smem:[#allocation11 + $0xc]]  ;;  %s1136_s14 = smov [#allocation12]  }
  0x49   :  { %s841_s21 = sld [smem:[#allocation11 + $0xd]] }
  0x4a   :  { %s843_s22 = sld [smem:[#allocation11 + $0xe]] }
  0x4b   :  { %s845_s23 = sld [smem:[#allocation11 + $0xf]] }
  0x4c   :  { %s847_s24 = sld [smem:[#allocation11 + $0x10]] }
  0x4d   :  { %s849_s25 = sld [smem:[#allocation11 + $0x11]] }
  0x4e   :  { %s851_s26 = sld [smem:[#allocation11 + $0x12]] }
  0x4f   :  { %s853_s27 = sld [smem:[#allocation11 + $0x13]] }
  0x50   :  { %s855_s28 = sld [smem:[#allocation11 + $0x14]] }
  0x51   :  { %s857_s1 = sld [smem:[#allocation11 + $0x15]] }
  0x52   :  { %s859_s29 = sld [smem:[#allocation11 + $0x16]] }
  0x53   :  { %s861_s30 = sld [smem:[#allocation11 + $0x17]] }
  0x54   :  { %s863_s8 = sld [smem:[#allocation11 + $0x18]] }
  0x55   :  { %s865_s9 = sld [smem:[#allocation11 + $0x19]] }
  0x56   :  { %s867_s10 = sld [smem:[#allocation11 + $0x1a]] }
  0x57   :  { %s869_s11 = sld [smem:[#allocation11 + $0x1b]] }
  0x58   :  { %s871_s12 = sld [smem:[#allocation11 + $0x1c]] }
  0x59   :  { %s873_s3 = sld [smem:[#allocation11 + $0x1d]] }
  0x5a   :  { %s875_s5 = sld [smem:[#allocation11 + $0x1e]] }
  0x5b   :  { %s877_s13 = sld [smem:[#allocation11 + $0x1f]] }
  0xbb   :  { %v191_v21 = vpop.permute.xlu1 %190 }
  0xbd   :  { %v181_v22 = vpop.permute.xlu0 %180 }
  0xbf   :  { %v196_v29 = vpop.permute.xlu1 %195 }
  0xc1   :  { %v186_v27 = vpop.permute.xlu0 %185 }
  0xfe   :  { %v161_v23 = vpop.f32.mrf.mxu0 }
  0xff   :  { %v162_v24 = vadd.f32 %v808_v20, %v161_v23 }
 0x100   :  { %v902_v25 = vpop.f32.mrf.mxu0  ;;  %v913_v26 = vpop.f32.mrf.mxu1 }
 0x101   :  { %165 = vst.msk [vmem:[#allocation2] sm:$0xff] %vm91_vm1, %v162_v24  ;;  %v282_v30 = vadd.f32 %v913_v26, %v186_v27 }
 0x102   :  { %v276_v28 = vpop.f32.mrf.mxu1 }
 0x103   :  { %v277_v31 = vadd.f32 %v276_v28, %v181_v22  ;;  %296 = vst [vmem:[#allocation3 + $0x8] sm:$0xff] %v282_v30  ;;  %v361_v30 = vstv %s821_s15  ;;  %s797_s15 = sshll.u32 %s1136_s14, 4  ;;  %s798_s15 = int_to_ptr.vmem [resolvable:$true] %s797_s15 }
 0x104   :  { %v916_v32 = vpop.f32.mrf.mxu1  ;;  %p1073_p7 = scmp.lt.s32.totalorder %s798_s15, %s798_s15 }
 0x105   :  { %295 = vst [vmem:[#allocation3] sm:$0xff] %v277_v31  ;;  %v292_v33 = vadd.f32 %v916_v32, %v196_v29 }
 0x106   :  { %v286_v34 = vpop.f32.mrf.mxu1 }
 0x107   :  { %298 = vst [vmem:[#allocation3 + $0x18] sm:$0xff] %v292_v33  ;;  %v287_v35 = vadd.f32 %v286_v34, %v191_v21 }
 0x108   :  { %v1222_v36 = vld [vmem:[#allocation2] sm:$0xff] }
 0x109   :  { %321 = vperm.xlu1 %960, %v1222_v36   ;;  %306 = vperm.xlu0 %958, %v1222_v36   ;;  %297 = vst [vmem:[#allocation3 + $0x10] sm:$0xff] %v287_v35 }
 0x10c   :  { %v816_v3 = vld [vmem:[#allocation3 + $0x1] ss:$0 sm:$0xff]  ;;  %v815_v4 = vld [vmem:[#allocation3] ss:$0 sm:$0xff]  ;;  %v818_v11 = vld [vmem:[#allocation3 + $0x2] ss:$0 sm:$0xff] }
 0x10d   :  { %961 = vset.pattern.permute.xlu1 %v1106_v37  ;;  %963 = vset.pattern.permute.xlu0 %v1107_v38  ;;  %v822_v21 = vld [vmem:[#allocation3 + $0x4] ss:$0 sm:$0xff]  ;;  %v820_v23 = vld [vmem:[#allocation3 + $0x3] ss:$0 sm:$0xff]  ;;  %v824_v32 = vld [vmem:[#allocation3 + $0x5] ss:$0 sm:$0xff]  ;;  %v376_v37 = vstv %s823_s16 }
 0x10e   :  { %336 = vperm.xlu1 %961, %v1222_v36   ;;  %366 = vperm.xlu0 %963, %v1222_v36   ;;  %s1068_s16 = scalar_lea.vmem %s798_s15, 128 }
 0x10f   :  { %p1069_p6 = scmp.ne.s32.totalorder %s798_s15, %s1068_s16  ;;  %p1074_p8 = scmp.lt.s32.totalorder %s1068_s16, %s1068_s16 }
 0x111   :  { %p1075_p9 = por %p1074_p8, %p1073_p7 }
 0x112   :  { %962 = vset.pattern.permute.xlu1 %v1108_v39  ;;  %966 = vset.pattern.permute.xlu0 %v1109_v40  ;;  %v828_v40 = vld [vmem:[#allocation3 + $0x7] ss:$0 sm:$0xff] }
 0x113   :  { %351 = vperm.xlu1 %962, %v1222_v36   ;;  %411 = vperm.xlu0 %966, %v1222_v36   ;;  %p1076_p10 = pnand %p1075_p9, %p1069_p6 }
 0x117   :  { %964 = vset.pattern.permute.xlu1 %v1110_v41  ;;  %969 = vset.pattern.permute.xlu0 %v1111_v42  ;;  %v391_v42 = vstv %s825_s2 }
 0x118   :  { %381 = vperm.xlu1 %964, %v1222_v36   ;;  %456 = vperm.xlu0 %969, %v1222_v36  }
 0x11c   :  { %965 = vset.pattern.permute.xlu1 %v1112_v43  ;;  %971 = vset.pattern.permute.xlu0 %v1113_v44  ;;  %v826_v44 = vld [vmem:[#allocation3 + $0x6] ss:$0 sm:$0xff] }
 0x11d   :  { %396 = vperm.xlu1 %965, %v1222_v36   ;;  %486 = vperm.xlu0 %971, %v1222_v36  }
 0x121   :  { %967 = vset.pattern.permute.xlu1 %v1114_v45  ;;  %974 = vset.pattern.permute.xlu0 %v1115_v46 }
 0x122   :  { %426 = vperm.xlu1 %967, %v1222_v36   ;;  %531 = vperm.xlu0 %974, %v1222_v36  }
 0x126   :  { %968 = vset.pattern.permute.xlu1 %v1116_v47  ;;  %977 = vset.pattern.permute.xlu0 %v1117_v48 }
 0x127   :  { %441 = vperm.xlu1 %968, %v1222_v36   ;;  %576 = vperm.xlu0 %977, %v1222_v36  }
 0x12b   :  { %970 = vset.pattern.permute.xlu1 %v1118_v49  ;;  %979 = vset.pattern.permute.xlu0 %v1119_v50 }
 0x12c   :  { %471 = vperm.xlu1 %970, %v1222_v36   ;;  %606 = vperm.xlu0 %979, %v1222_v36  }
 0x130   :  { %972 = vset.pattern.permute.xlu1 %v1120_v51  ;;  %982 = vset.pattern.permute.xlu0 %v1121_v52  ;;  %v406_v51 = vstv %s827_s17 }
 0x131   :  { %501 = vperm.xlu1 %972, %v1222_v36   ;;  %651 = vperm.xlu0 %982, %v1222_v36  }
 0x135   :  { %973 = vset.pattern.permute.xlu1 %v1122_v53  ;;  %985 = vset.pattern.permute.xlu0 %v1123_v54  ;;  %v830_v53 = vld [vmem:[#allocation3 + $0x8] ss:$0 sm:$0xff] }
 0x136   :  { %516 = vperm.xlu1 %973, %v1222_v36   ;;  %696 = vperm.xlu0 %985, %v1222_v36  }
 0x13a   :  { %975 = vset.pattern.permute.xlu1 %v1124_v55  ;;  %988 = vset.pattern.permute.xlu0 %v1125_v56 }
 0x13b   :  { %546 = vperm.xlu1 %975, %v1222_v36   ;;  %741 = vperm.xlu0 %988, %v1222_v36  }
 0x13f   :  { %976 = vset.pattern.permute.xlu1 %v1126_v57  ;;  %991 = vset.pattern.permute.xlu0 %v1127_v58 }
 0x140   :  { %561 = vperm.xlu1 %976, %v1222_v36  }
 0x144   :  { %978 = vset.pattern.permute.xlu1 %v1128_v59  ;;  %v834_v59 = vld [vmem:[#allocation3 + $0xa] ss:$0 sm:$0xff] }
 0x145   :  { %591 = vperm.xlu1 %978, %v1222_v36  }
 0x149   :  { %980 = vset.pattern.permute.xlu1 %v1129_v60 }
 0x14a   :  { %621 = vperm.xlu1 %980, %v1222_v36  }
 0x14e   :  { %981 = vset.pattern.permute.xlu1 %v1130_v61 }
 0x14f   :  { %636 = vperm.xlu1 %981, %v1222_v36  }
 0x153   :  { %983 = vset.pattern.permute.xlu1 %v1131_v62 }
 0x154   :  { %666 = vperm.xlu1 %983, %v1222_v36  }
 0x158   :  { %984 = vset.pattern.permute.xlu1 %v1132_v63  ;;  %v436_v63 = vstv %s831_s19 }
 0x159   :  { %681 = vperm.xlu1 %984, %v1222_v36  }
 0x15d   :  { %986 = vset.pattern.permute.xlu1 %v1133_v0 }
 0x15e   :  { %711 = vperm.xlu1 %986, %v1222_v36  }
 0x162   :  { %987 = vset.pattern.permute.xlu1 %v1134_v1  ;;  %v832_v1 = vld [vmem:[#allocation3 + $0x9] ss:$0 sm:$0xff] }
 0x163   :  { %726 = vperm.xlu1 %987, %v1222_v36  }
 0x167   :  { %989 = vset.pattern.permute.xlu1 %v1135_v2 }
 0x168   :  { %756 = vperm.xlu1 %989, %v1222_v36  }
 0x16c   :  { %990 = vset.pattern.permute.xlu1 %v1127_v58  ;;  %v421_v58 = vstv %s829_s18 }
 0x16d   :  { %771 = vperm.xlu1 %990, %v1222_v36  }
 0x184   :  { %v322_v5 = vpop.permute.xlu1 %321  ;;  %v307_v6 = vpop.permute.xlu0 %306 }
 0x185   :  { %v328_v7 = vadd.f32 %v816_v3, %v322_v5  ;;  %v313_v8 = vadd.f32 %v815_v4, %v307_v6 }
 0x187   :  { %v314_v10 = vmax.f32 %v313_v8, 0.0  ;;  %v329_v13 = vmax.f32 %v328_v7, 0.0  ;;  %v451_v8 = vstv %s833_s20 }
 0x189   :  { %v317_v14 = vmul.f32 %v316_v9, %v314_v10  ;;  %v337_v15 = vpop.permute.xlu1 %336  ;;  %v367_v22 = vpop.permute.xlu0 %366  ;;  %v332_v24 = vmul.f32 %v331_v16, %v329_v13  ;;  %v838_v10 = vld [vmem:[#allocation3 + $0xc] ss:$0 sm:$0xff]  ;;  %v836_v13 = vld [vmem:[#allocation3 + $0xb] ss:$0 sm:$0xff] }
 0x18a   :  { %v343_v17 = vadd.f32 %v818_v11, %v337_v15  ;;  %v373_v28 = vadd.f32 %v822_v21, %v367_v22  ;;  %v481_v22 = vstv %s837_s4 }
 0x18b   :  { %v318_v18 = vadd.f32 %v317_v14, %v300_v12  ;;  %v466_v14 = vstv %s835_s0 }
 0x18c   :  { %v344_v20 = vmax.f32 %v343_v17, 0.0  ;;  %v374_v34 = vmax.f32 %v373_v28, 0.0 }
 0x18d   :  { %v333_v26 = vadd.f32 %v332_v24, %v318_v18 }
 0x18e   :  { %v352_v25 = vpop.permute.xlu1 %351  ;;  %v347_v27 = vmul.f32 %v346_v19, %v344_v20  ;;  %v412_v41 = vpop.permute.xlu0 %411  ;;  %v377_v45 = vmul.f32 %v376_v37, %v374_v34  ;;  %v511_v34 = vstv %s841_s21  ;;  %v842_v37 = vld [vmem:[#allocation3 + $0xe] ss:$0 sm:$0xff] }
 0x18f   :  { %v358_v29 = vadd.f32 %v820_v23, %v352_v25  ;;  %v418_v47 = vadd.f32 %v828_v40, %v412_v41 }
 0x190   :  { %v348_v33 = vadd.f32 %v347_v27, %v333_v26  ;;  %v840_v27 = vld [vmem:[#allocation3 + $0xd] ss:$0 sm:$0xff] }
 0x191   :  { %v359_v31 = vmax.f32 %v358_v29, 0.0  ;;  %v419_v54 = vmax.f32 %v418_v47, 0.0  ;;  %v496_v29 = vstv %s1256_s6 }
 0x193   :  { %v362_v35 = vmul.f32 %v361_v30, %v359_v31  ;;  %v382_v36 = vpop.permute.xlu1 %381  ;;  %v457_v60 = vpop.permute.xlu0 %456  ;;  %v422_v2 = vmul.f32 %v421_v58, %v419_v54  ;;  %v850_v54 = vld [vmem:[#allocation3 + $0x12] ss:$0 sm:$0xff] }
 0x194   :  { %v388_v38 = vadd.f32 %v824_v32, %v382_v36  ;;  %v463_v3 = vadd.f32 %v834_v59, %v457_v60  ;;  %v844_v32 = vld [vmem:[#allocation3 + $0xf] ss:$0 sm:$0xff]  ;;  %v848_v59 = vld [vmem:[#allocation3 + $0x11] ss:$0 sm:$0xff] }
 0x195   :  { %v363_v39 = vadd.f32 %v362_v35, %v348_v33 }
 0x196   :  { %v389_v43 = vmax.f32 %v388_v38, 0.0  ;;  %v464_v9 = vmax.f32 %v463_v3, 0.0 }
 0x197   :  { %v378_v48 = vadd.f32 %v377_v45, %v363_v39 }
 0x198   :  { %v397_v46 = vpop.permute.xlu1 %396  ;;  %v392_v49 = vmul.f32 %v391_v42, %v389_v43  ;;  %v487_v11 = vpop.permute.xlu0 %486  ;;  %v467_v20 = vmul.f32 %v466_v14, %v464_v9  ;;  %v526_v43 = vstv %s843_s22  ;;  %v601_v14 = vstv %s853_s27 }
 0x199   :  { %v403_v50 = vadd.f32 %v826_v44, %v397_v46  ;;  %v493_v18 = vadd.f32 %v838_v10, %v487_v11 }
 0x19a   :  { %v393_v55 = vadd.f32 %v392_v49, %v378_v48  ;;  %v846_v48 = vld [vmem:[#allocation3 + $0x10] ss:$0 sm:$0xff] }
 0x19b   :  { %v404_v52 = vmax.f32 %v403_v50, 0.0  ;;  %v494_v25 = vmax.f32 %v493_v18, 0.0  ;;  %v541_v50 = vstv %s845_s23 }
 0x19d   :  { %v407_v56 = vmul.f32 %v406_v51, %v404_v52  ;;  %v427_v57 = vpop.permute.xlu1 %426  ;;  %v532_v33 = vpop.permute.xlu0 %531  ;;  %v497_v36 = vmul.f32 %v496_v29, %v494_v25  ;;  %v631_v25 = vstv %s857_s1  ;;  %v858_v29 = vld [vmem:[#allocation3 + $0x16] ss:$0 sm:$0xff] }
 0x19e   :  { %v433_v61 = vadd.f32 %v830_v53, %v427_v57  ;;  %v538_v39 = vadd.f32 %v844_v32, %v532_v33 }
 0x19f   :  { %v408_v62 = vadd.f32 %v407_v56, %v393_v55  ;;  %v556_v55 = vstv %s847_s24 }
 0x1a0   :  { %v434_v0 = vmax.f32 %v433_v61, 0.0  ;;  %v539_v45 = vmax.f32 %v538_v39, 0.0 }
 0x1a1   :  { %v423_v5 = vadd.f32 %v422_v2, %v408_v62 }
 0x1a2   :  { %v442_v4 = vpop.permute.xlu1 %441  ;;  %v437_v6 = vmul.f32 %v436_v63, %v434_v0  ;;  %v577_v51 = vpop.permute.xlu0 %576  ;;  %v542_v57 = vmul.f32 %v541_v50, %v539_v45  ;;  %v571_v0 = vstv %s849_s25  ;;  %v864_v50 = vld [vmem:[#allocation3 + $0x19] ss:$0 sm:$0xff] }
 0x1a3   :  { %v448_v7 = vadd.f32 %v832_v1, %v442_v4  ;;  %v583_v58 = vadd.f32 %v850_v54, %v577_v51  ;;  %v586_v4 = vstv %s851_s26 }
 0x1a4   :  { %v438_v15 = vadd.f32 %v437_v6, %v423_v5  ;;  %v854_v5 = vld [vmem:[#allocation3 + $0x14] ss:$0 sm:$0xff] }
 0x1a5   :  { %v449_v12 = vmax.f32 %v448_v7, 0.0  ;;  %v584_v1 = vmax.f32 %v583_v58, 0.0 }
 0x1a7   :  { %v452_v16 = vmul.f32 %v451_v8, %v449_v12  ;;  %v472_v17 = vpop.permute.xlu1 %471  ;;  %v607_v2 = vpop.permute.xlu0 %606  ;;  %v852_v8 = vld [vmem:[#allocation3 + $0x13] ss:$0 sm:$0xff]  ;;  %v587_v12 = vmul.f32 %v586_v4, %v584_v1 }
 0x1a8   :  { %v478_v19 = vadd.f32 %v836_v13, %v472_v17  ;;  %v613_v10 = vadd.f32 %v854_v5, %v607_v2 }
 0x1a9   :  { %v453_v21 = vadd.f32 %v452_v16, %v438_v15 }
 0x1aa   :  { %v479_v23 = vmax.f32 %v478_v19, 0.0  ;;  %v614_v17 = vmax.f32 %v613_v10, 0.0  ;;  %v856_v19 = vld [vmem:[#allocation3 + $0x15] ss:$0 sm:$0xff] }
 0x1ab   :  { %v468_v24 = vadd.f32 %v467_v20, %v453_v21  ;;  %v616_v21 = vstv %s855_s28 }
 0x1ac   :  { %v482_v26 = vmul.f32 %v481_v22, %v479_v23  ;;  %v502_v28 = vpop.permute.xlu1 %501 }
 0x1ad   :  { %v508_v30 = vadd.f32 %v840_v27, %v502_v28  ;;  %v617_v27 = vmul.f32 %v616_v21, %v614_v17  ;;  %v860_v28 = vld [vmem:[#allocation3 + $0x17] ss:$0 sm:$0xff] }
 0x1ae   :  { %v483_v31 = vadd.f32 %v482_v26, %v468_v24  ;;  %v652_v24 = vpop.permute.xlu0 %651 }
 0x1af   :  { %v509_v35 = vmax.f32 %v508_v30, 0.0 }
 0x1b0   :  { %v498_v40 = vadd.f32 %v497_v36, %v483_v31  ;;  %v658_v31 = vadd.f32 %v860_v28, %v652_v24 }
 0x1b1   :  { %v517_v38 = vpop.permute.xlu1 %516  ;;  %v512_v41 = vmul.f32 %v511_v34, %v509_v35  ;;  %v646_v35 = vstv %s859_s29 }
 0x1b2   :  { %v523_v42 = vadd.f32 %v842_v37, %v517_v38  ;;  %v659_v37 = vmax.f32 %v658_v31, 0.0  ;;  %v697_v45 = vpop.permute.xlu0 %696  ;;  %v781_v31 = vstv %s877_s13 }
 0x1b3   :  { %v513_v46 = vadd.f32 %v512_v41, %v498_v40  ;;  %v862_v40 = vld [vmem:[#allocation3 + $0x18] ss:$0 sm:$0xff] }
 0x1b4   :  { %v524_v44 = vmax.f32 %v523_v42, 0.0  ;;  %v661_v42 = vstv %s861_s30 }
 0x1b6   :  { %v527_v47 = vmul.f32 %v526_v43, %v524_v44  ;;  %v547_v49 = vpop.permute.xlu1 %546  ;;  %v742_v2 = vpop.permute.xlu0 %741 }
 0x1b7   :  { %v553_v52 = vadd.f32 %v846_v48, %v547_v49  ;;  %v662_v48 = vmul.f32 %v661_v42, %v659_v37  ;;  %v866_v49 = vld [vmem:[#allocation3 + $0x1a] ss:$0 sm:$0xff] }
 0x1b8   :  { %v528_v53 = vadd.f32 %v527_v47, %v513_v46  ;;  %v676_v46 = vstv %s863_s8 }
 0x1b9   :  { %v554_v56 = vmax.f32 %v553_v52, 0.0  ;;  %v703_v52 = vadd.f32 %v866_v49, %v697_v45 }
 0x1ba   :  { %v543_v61 = vadd.f32 %v542_v57, %v528_v53 }
 0x1bb   :  { %v562_v60 = vpop.permute.xlu1 %561  ;;  %v557_v62 = vmul.f32 %v556_v55, %v554_v56  ;;  %v691_v56 = vstv %s865_s9  ;;  %v704_v58 = vmax.f32 %v703_v52, 0.0 }
 0x1bc   :  { %v568_v63 = vadd.f32 %v848_v59, %v562_v60 }
 0x1bd   :  { %v558_v6 = vadd.f32 %v557_v62, %v543_v61  ;;  %v868_v61 = vld [vmem:[#allocation3 + $0x1b] ss:$0 sm:$0xff] }
 0x1be   :  { %v569_v3 = vmax.f32 %v568_v63, 0.0  ;;  %v706_v63 = vstv %s867_s10 }
 0x1bf   :  { %v707_v5 = vmul.f32 %v706_v63, %v704_v58 }
 0x1c0   :  { %v572_v7 = vmul.f32 %v571_v0, %v569_v3  ;;  %v592_v9 = vpop.permute.xlu1 %591  ;;  %v721_v3 = vstv %s869_s11 }
 0x1c1   :  { %v598_v11 = vadd.f32 %v852_v8, %v592_v9 }
 0x1c2   :  { %v573_v13 = vadd.f32 %v572_v7, %v558_v6  ;;  %v872_v6 = vld [vmem:[#allocation3 + $0x1d] ss:$0 sm:$0xff]  ;;  %v870_v7 = vld [vmem:[#allocation3 + $0x1c] ss:$0 sm:$0xff] }
 0x1c3   :  { %v599_v15 = vmax.f32 %v598_v11, 0.0  ;;  %v748_v9 = vadd.f32 %v872_v6, %v742_v2 }
 0x1c4   :  { %v588_v16 = vadd.f32 %v587_v12, %v573_v13  ;;  %v736_v13 = vstv %s871_s12 }
 0x1c5   :  { %v602_v18 = vmul.f32 %v601_v14, %v599_v15  ;;  %v622_v20 = vpop.permute.xlu1 %621  ;;  %v749_v15 = vmax.f32 %v748_v9, 0.0 }
 0x1c6   :  { %v628_v22 = vadd.f32 %v856_v19, %v622_v20  ;;  %v751_v20 = vstv %s873_s3 }
 0x1c7   :  { %v603_v23 = vadd.f32 %v602_v18, %v588_v16  ;;  %v874_v18 = vld [vmem:[#allocation3 + $0x1e] ss:$0 sm:$0xff] }
 0x1c8   :  { %v629_v26 = vmax.f32 %v628_v22, 0.0 }
 0x1c9   :  { %v618_v32 = vadd.f32 %v617_v27, %v603_v23  ;;  %v766_v23 = vstv %s875_s5 }
 0x1ca   :  { %v637_v30 = vpop.permute.xlu1 %636  ;;  %v632_v33 = vmul.f32 %v631_v25, %v629_v26  ;;  %v752_v25 = vmul.f32 %v751_v20, %v749_v15  ;;  %v876_v26 = vld [vmem:[#allocation3 + $0x1f] ss:$0 sm:$0xff] }
 0x1cb   :  { %v643_v34 = vadd.f32 %v858_v29, %v637_v30 }
 0x1cc   :  { %v633_v38 = vadd.f32 %v632_v33, %v618_v32 }
 0x1cd   :  { %v644_v36 = vmax.f32 %v643_v34, 0.0 }
 0x1cf   :  { %v647_v39 = vmul.f32 %v646_v35, %v644_v36  ;;  %v667_v41 = vpop.permute.xlu1 %666 }
 0x1d0   :  { %v673_v43 = vadd.f32 %v862_v40, %v667_v41 }
 0x1d1   :  { %v648_v44 = vadd.f32 %v647_v39, %v633_v38 }
 0x1d2   :  { %v674_v47 = vmax.f32 %v673_v43, 0.0 }
 0x1d3   :  { %v663_v53 = vadd.f32 %v662_v48, %v648_v44 }
 0x1d4   :  { %v682_v51 = vpop.permute.xlu1 %681  ;;  %v677_v54 = vmul.f32 %v676_v46, %v674_v47 }
 0x1d5   :  { %v688_v55 = vadd.f32 %v864_v50, %v682_v51 }
 0x1d6   :  { %v678_v59 = vadd.f32 %v677_v54, %v663_v53 }
 0x1d7   :  { %v689_v57 = vmax.f32 %v688_v55, 0.0 }
 0x1d9   :  { %v692_v60 = vmul.f32 %v691_v56, %v689_v57  ;;  %v712_v62 = vpop.permute.xlu1 %711 }
 0x1da   :  { %v718_v0 = vadd.f32 %v868_v61, %v712_v62 }
 0x1db   :  { %v693_v1 = vadd.f32 %v692_v60, %v678_v59 }
 0x1dc   :  { %v719_v4 = vmax.f32 %v718_v0, 0.0 }
 0x1dd   :  { %v708_v10 = vadd.f32 %v707_v5, %v693_v1 }
 0x1de   :  { %v727_v8 = vpop.permute.xlu1 %726  ;;  %v722_v11 = vmul.f32 %v721_v3, %v719_v4 }
 0x1df   :  { %v733_v12 = vadd.f32 %v870_v7, %v727_v8 }
 0x1e0   :  { %v723_v16 = vadd.f32 %v722_v11, %v708_v10 }
 0x1e1   :  { %v734_v14 = vmax.f32 %v733_v12, 0.0 }
 0x1e3   :  { %v737_v17 = vmul.f32 %v736_v13, %v734_v14  ;;  %v757_v19 = vpop.permute.xlu1 %756 }
 0x1e4   :  { %v763_v21 = vadd.f32 %v874_v18, %v757_v19 }
 0x1e5   :  { %v738_v22 = vadd.f32 %v737_v17, %v723_v16 }
 0x1e6   :  { %v764_v24 = vmax.f32 %v763_v21, 0.0 }
 0x1e7   :  { %v753_v28 = vadd.f32 %v752_v25, %v738_v22 }
 0x1e8   :  { %v772_v27 = vpop.permute.xlu1 %771  ;;  %v767_v29 = vmul.f32 %v766_v23, %v764_v24 }
 0x1e9   :  { %v778_v30 = vadd.f32 %v876_v26, %v772_v27 }
 0x1ea   :  { %v768_v33 = vadd.f32 %v767_v29, %v753_v28 }
 0x1eb   :  { %v779_v32 = vmax.f32 %v778_v30, 0.0 }
 0x1ed   :  { %v782_v34 = vmul.f32 %v781_v31, %v779_v32 }
 0x1ef   :  { %v783_v35 = vadd.f32 %v782_v34, %v768_v33 }
 0x1f1   :  { %v878_v36 = vmul.f32 -1.442695, %v783_v35 }
 0x1f3   :  { %992 = vpow2.f32 %v878_v36 }
 0x200   :  { %v993_v37 = vpop.eup %992 }
 0x201   :  { %v787_v38 = vadd.f32 1.0, %v993_v37 }
 0x203   :  { %994 = vrcp.f32 %v787_v38 }
 0x210   :  { %v995_v39 = vpop.eup %994 }
 0x211   :  { %790 = vst [vmem:[#allocation12] sm:$0xff] %v995_v39 }
 0x212   :  { %1079 = shalt.err (!%p1076_p10)
}
 0x213   :  { %800 = dma.vmem_to_hbm [thread:$0]  %s798_s15, 128, %s1269_s7, [#allocation6]  }
 0x214   :  { %1094 = dma.done.wait [#allocation6], 128  }
 0x215   :  { %1095 = vsyncadd [#allocation6], 4294967168 }
 0x216   :  { %804 = vsyncpa [#allocation5], 1 }
 0x217   :  { %805 = vsyncpa [#allocation9], 1 }
 0x218   :  { %806 = vsyncpa [#allocation6], 1 }
 0x219   :  { %807 = vsyncpa [#allocation7], 1 }

</bundles_post_ra>
